<compile_context>
chip_gen: v7x
topology: tpu7x:2x2x1
jax: 0.10.0
libtpu: 0.0.40
codegen_flags: <defaults>
</compile_context>

<pallas_src>
import functools

import numpy as np
import jax
import jax.numpy as jnp
from jax.experimental import pallas as pl
from jax.experimental.pallas import tpu as pltpu

HIDDEN = 32          # d_model
NHEAD = 4
HEAD_DIM = HIDDEN // NHEAD
NUM_LAYERS = 3
FFN = 2048           # nn.TransformerEncoderLayer default dim_feedforward
TN = 512             # FFN chunk width (multiple of 256 / 128 for v6e / v5e MXU fill)
EPS = 1e-5           # LayerNorm eps (PyTorch default)
MAX_LEN = 64         # positional-encoding table length used here
NEG_INF = -1e30


# ----------------------------- kernel -------------------------------------- #

def _layer_norm(x, gamma, beta):
    # x: (N, D); gamma/beta: (1, D); biased variance, like torch.nn.LayerNorm.
    mu = jnp.mean(x, axis=-1, keepdims=True)
    var = jnp.mean((x - mu) * (x - mu), axis=-1, keepdims=True)
    return (x - mu) * jax.lax.rsqrt(var + EPS) * gamma + beta


def fused_encoder_kernel(src_ref, we_ref, bepe_ref, mask_ref,
                         wq_ref, wk_ref, wv_ref, bq_ref, bk_ref, bv_ref,
                         wo_ref, bo_ref, g1_ref, b1_ref,
                         w1_ref, bf1_ref, w2_ref, bf2_ref, g2_ref, b2_ref,
                         out_ref,
                         x_scr, y_scr, acc_scr, attn_scr,
                         *, H, HD):
    l = pl.program_id(0)
    j = pl.program_id(1)

    # ---- embedding: Linear(F, D) + (bias + positional encoding), runs once ----
    @pl.when(jnp.logical_and(l == 0, j == 0))
    def _():
        x_scr[...] = (jnp.dot(src_ref[...], we_ref[...],
                              preferred_element_type=jnp.float32)
                      + bepe_ref[...])

    # ---- self-attention + residual + LayerNorm1 (once per layer, at j == 0) ---
    @pl.when(j == 0)
    def _():
        x = x_scr[...]
        # wq/bq are pre-scaled by 1/sqrt(HEAD_DIM) in init_params (no `* scale` here)
        q = jnp.dot(x, wq_ref[...], preferred_element_type=jnp.float32) + bq_ref[...]
        k = jnp.dot(x, wk_ref[...], preferred_element_type=jnp.float32) + bk_ref[...]
        v = jnp.dot(x, wv_ref[...], preferred_element_type=jnp.float32) + bv_ref[...]
        mask = mask_ref[...]                               # (BS, BS) block-diag 0 / -inf
        for h in range(H):                                 # static unroll over 4 heads
            sl = slice(h * HD, (h + 1) * HD)
            qh, kh, vh = q[:, sl], k[:, sl], v[:, sl]      # (BS, HD) each
            s = jax.lax.dot_general(qh, kh, (((1,), (1,)), ((), ())),
                                    preferred_element_type=jnp.float32)   # (BS, BS)
            s = s + mask                                   # kill cross-batch quadrants
            s = s - jnp.max(s, axis=-1, keepdims=True)
            p = jnp.exp(s)
            p = p * pl.reciprocal(jnp.sum(p, axis=-1, keepdims=True), approx=True)
            attn_scr[:, sl] = jnp.dot(p, vh, preferred_element_type=jnp.float32)
        # single out-projection matmul (== out_proj(concat(heads)))
        attn = (jnp.dot(attn_scr[...], wo_ref[...],
                        preferred_element_type=jnp.float32) + bo_ref[...])
        y_scr[...] = _layer_norm(x + attn, g1_ref[...], b1_ref[...])
        acc_scr[...] = jnp.zeros_like(acc_scr)

    # ---- FFN chunk j: (BS, D) @ (D, TN) -> ReLU -> @ (TN, D), accumulate ------
    yb = y_scr[...].astype(jnp.bfloat16)                   # bf16 MXU path, f32 acc
    ff = (jnp.dot(yb, w1_ref[...], preferred_element_type=jnp.float32)
          + bf1_ref[...])
    ff = jnp.maximum(ff, 0.0)
    acc_scr[...] += jnp.dot(ff.astype(jnp.bfloat16), w2_ref[...],
                            preferred_element_type=jnp.float32)

    # ---- residual + LayerNorm2 (+ final output store) at the last FFN chunk ---
    @pl.when(j == pl.num_programs(1) - 1)
    def _():
        x_new = _layer_norm(y_scr[...] + acc_scr[...] + bf2_ref[...],
                            g2_ref[...], b2_ref[...])
        x_scr[...] = x_new

        @pl.when(l == pl.num_programs(0) - 1)
        def _():
            out_ref[...] = x_new


# ----------------------------- wrapper -------------------------------------- #

def transformer_encoder_forward(src, params):
    """src: (B, S, n_features) float32 -> (B, S, HIDDEN) float32."""
    # TODO(synk): src_key_padding_mask is not supported (module is called with None here).
    # TODO(synk): v7x second TensorCore is left idle; a batch-parallel leading grid axis
    #             would need per-core activation scratch and is not implemented.
    B, S, F = src.shape
    assert S <= MAX_LEN, f"sequence length {S} exceeds positional table {MAX_LEN}"
    BS, D = B * S, HIDDEN
    nj = FFN // TN

    src2 = src.reshape(BS, F)
    # combined embedding bias + positional encoding, tiled to (B*S, D)
    bepe = jnp.tile(params['be'] + params['pe'][:S], (B, 1))
    # block-diagonal mask: rows of different batch elements must not attend to each other
    rows = np.arange(BS) // S
    mask = jnp.asarray(np.where(rows[:, None] == rows[None, :], 0.0, NEG_INF),
                       dtype=jnp.float32)

    kernel = functools.partial(fused_encoder_kernel, H=NHEAD, HD=HEAD_DIM)

    def const2d(shape):                    # resident (constant block index) input
        return pl.BlockSpec(shape, lambda l, j: (0, 0))

    def per_layer(a, b):                   # (L, a, b) -> (a, b) block for layer l
        return pl.BlockSpec((None, a, b), lambda l, j: (l, 0, 0))

    in_specs = [
        const2d((BS, F)),                                   # src (flattened)
        const2d((F, D)),                                    # we_t
        const2d((BS, D)),                                   # bepe
        const2d((BS, BS)),                                  # mask
        per_layer(D, D),                                    # wq_t (pre-scaled)
        per_layer(D, D),                                    # wk_t
        per_layer(D, D),                                    # wv_t
        per_layer(1, D),                                    # bq (pre-scaled)
        per_layer(1, D),                                    # bk
        per_layer(1, D),                                    # bv
        per_layer(D, D),                                    # wo_t
        per_layer(1, D),                                    # bo
        per_layer(1, D),                                    # g1
        per_layer(1, D),                                    # b1
        pl.BlockSpec((None, D, TN), lambda l, j: (l, 0, j)),  # w1_t (bf16), chunked
        pl.BlockSpec((None, 1, TN), lambda l, j: (l, 0, j)),  # bf1, chunked
        pl.BlockSpec((None, TN, D), lambda l, j: (l, j, 0)),  # w2_t (bf16), chunked
        per_layer(1, D),                                    # bf2
        per_layer(1, D),                                    # g2
        per_layer(1, D),                                    # b2
    ]

    args = (src2, params['we_t'], bepe, mask,
            params['wq_t'], params['wk_t'], params['wv_t'],
            params['bq'], params['bk'], params['bv'],
            params['wo_t'], params['bo'],
            params['g1'], params['b1'],
            params['w1_t'], params['bf1'], params['w2_t'], params['bf2'],
            params['g2'], params['b2'])

    flops = 2 * BS * (F * D + NUM_LAYERS * (4 * D * D + 2 * D * FFN
                                            + NHEAD * 2 * BS * HEAD_DIM))
    bytes_accessed = (sum(int(a.size) * a.dtype.itemsize for a in args)
                      + BS * D * 4)

    out = pl.pallas_call(
        kernel,
        out_shape=jax.ShapeDtypeStruct((BS, D), jnp.float32),
        grid=(NUM_LAYERS, nj),
        in_specs=in_specs,
        out_specs=pl.BlockSpec((BS, D), lambda l, j: (0, 0)),
        scratch_shapes=[
            pltpu.VMEM((BS, D), jnp.float32),   # x: residual stream across layers
            pltpu.VMEM((BS, D), jnp.float32),   # y: post-LN1 (FFN input / residual)
            pltpu.VMEM((BS, D), jnp.float32),   # FFN accumulator
            pltpu.VMEM((BS, D), jnp.float32),   # per-head attention output buffer
        ],
        compiler_params=pltpu.CompilerParams(
            dimension_semantics=("arbitrary", "arbitrary")),
        cost_estimate=pl.CostEstimate(
            flops=int(flops),
            transcendentals=NUM_LAYERS * NHEAD * BS * BS,
            bytes_accessed=int(bytes_accessed)),
    )(*args)

    return out.reshape(B, S, D)


# ----------------------------- parameter init ------------------------------- #

def _positional_encoding(max_len, d_model):
    position = np.arange(max_len, dtype=np.float64)[:, None]
    div_term = np.exp(np.arange(0, d_model, 2, dtype=np.float64)
                      * (-np.log(10000.0) / d_model))
    pe = np.zeros((max_len, d_model), dtype=np.float64)
    pe[:, 0::2] = np.sin(position * div_term)
    pe[:, 1::2] = np.cos(position * div_term)
    return jnp.asarray(pe, dtype=jnp.float32)


def init_params(key, n_features):
    def dense(k, fan_in, fan_out):
        # deterministic small init (synthetic weights, not a checkpoint)
        kw, kb = jax.random.split(k)
        w_t = jax.random.normal(kw, (fan_in, fan_out), jnp.float32) * (1.0 / np.sqrt(fan_in))
        b = jax.random.normal(kb, (1, fan_out), jnp.float32) * 0.01
        return w_t, b

    scale = 1.0 / np.sqrt(HEAD_DIM)
    keys = jax.random.split(key, 1 + NUM_LAYERS)
    we_t, be = dense(keys[0], n_features, HIDDEN)

    names = ('wq_t', 'wk_t', 'wv_t', 'bq', 'bk', 'bv', 'wo_t', 'bo',
             'g1', 'b1', 'w1_t', 'bf1', 'w2_t', 'bf2', 'g2', 'b2')
    per_layer = {n: [] for n in names}
    for li in range(NUM_LAYERS):
        lk = jax.random.split(keys[1 + li], 6)
        wq_t, bq = dense(lk[0], HIDDEN, HIDDEN)
        wk_t, bk = dense(lk[1], HIDDEN, HIDDEN)
        wv_t, bv = dense(lk[2], HIDDEN, HIDDEN)
        wo_t, bo = dense(lk[3], HIDDEN, HIDDEN)
        w1_t, bf1 = dense(lk[4], HIDDEN, FFN)
        w2_t, bf2 = dense(lk[5], FFN, HIDDEN)
        vals = dict(
            # fold the 1/sqrt(head_dim) attention scale into the q projection
            wq_t=wq_t * scale, bq=bq * scale,
            wk_t=wk_t, bk=bk, wv_t=wv_t, bv=bv,
            wo_t=wo_t, bo=bo,
            g1=jnp.ones((1, HIDDEN), jnp.float32),
            b1=jnp.zeros((1, HIDDEN), jnp.float32),
            # FFN weights stored in bf16 (kernel accumulates in f32)
            w1_t=w1_t.astype(jnp.bfloat16), bf1=bf1,
            w2_t=w2_t.astype(jnp.bfloat16), bf2=bf2,
            g2=jnp.ones((1, HIDDEN), jnp.float32),
            b2=jnp.zeros((1, HIDDEN), jnp.float32))
        for n in names:
            per_layer[n].append(vals[n])

    stacked = {n: jnp.stack(v) for n, v in per_layer.items()}   # (L, ...) each
    return dict(we_t=we_t, be=be, pe=_positional_encoding(MAX_LEN, HIDDEN), **stacked)


# ----------------------------- main ----------------------------------------- #

if __name__ == "__main__":
    B, S, N_FEATURES = 2, 8, 16
    key = jax.random.PRNGKey(0)
    k_x, k_p = jax.random.split(key)
    src = jax.random.normal(k_x, (B, S, N_FEATURES), jnp.float32)
    params = init_params(k_p, N_FEATURES)

    out = transformer_encoder_forward(src, params)
    out = jax.block_until_ready(out)
    assert out.shape == (B, S, HIDDEN) and out.dtype == jnp.float32
    assert bool(jnp.all(jnp.isfinite(out)))
    print("KERNEL_OK")
</pallas_src>

<mosaic_0001>
module attributes {stable_mosaic.version = 11 : i64} {
  func.func @fused_encoder_kernel(%arg0: i32, %arg1: i32, %arg2: memref<16x16xf32, #tpu.memory_space<vmem>>, %arg3: memref<16x32xf32, #tpu.memory_space<vmem>>, %arg4: memref<16x32xf32, #tpu.memory_space<vmem>>, %arg5: memref<16x16xf32, #tpu.memory_space<vmem>>, %arg6: memref<1x32x32xf32, #tpu.memory_space<vmem>>, %arg7: memref<1x32x32xf32, #tpu.memory_space<vmem>>, %arg8: memref<1x32x32xf32, #tpu.memory_space<vmem>>, %arg9: memref<1x1x32xf32, #tpu.memory_space<vmem>>, %arg10: memref<1x1x32xf32, #tpu.memory_space<vmem>>, %arg11: memref<1x1x32xf32, #tpu.memory_space<vmem>>, %arg12: memref<1x32x32xf32, #tpu.memory_space<vmem>>, %arg13: memref<1x1x32xf32, #tpu.memory_space<vmem>>, %arg14: memref<1x1x32xf32, #tpu.memory_space<vmem>>, %arg15: memref<1x1x32xf32, #tpu.memory_space<vmem>>, %arg16: memref<1x32x512xbf16, #tpu.memory_space<vmem>>, %arg17: memref<1x1x512xf32, #tpu.memory_space<vmem>>, %arg18: memref<1x512x32xbf16, #tpu.memory_space<vmem>>, %arg19: memref<1x1x32xf32, #tpu.memory_space<vmem>>, %arg20: memref<1x1x32xf32, #tpu.memory_space<vmem>>, %arg21: memref<1x1x32xf32, #tpu.memory_space<vmem>>, %arg22: memref<16x32xf32, #tpu.memory_space<vmem>>, %arg23: memref<16x32xf32, #tpu.memory_space<vmem>>, %arg24: memref<16x32xf32, #tpu.memory_space<vmem>>, %arg25: memref<16x32xf32, #tpu.memory_space<vmem>>, %arg26: memref<16x32xf32, #tpu.memory_space<vmem>>) attributes {dimension_semantics = [#tpu.dimension_semantics<arbitrary>, #tpu.dimension_semantics<arbitrary>], iteration_bounds = array<i64: 3, 4>, scalar_prefetch = 0 : i64, scratch_operands = 4 : i64, tpu.core_type = #tpu.core_type<tc>, window_params = [{pipeline_mode = #tpu.pipeline_mode<synchronous>, transform_indices = @transform_0, window_bounds = array<i64: 16, 16>}, {pipeline_mode = #tpu.pipeline_mode<synchronous>, transform_indices = @transform_1, window_bounds = array<i64: 16, 32>}, {pipeline_mode = #tpu.pipeline_mode<synchronous>, transform_indices = @transform_2, window_bounds = array<i64: 16, 32>}, {pipeline_mode = #tpu.pipeline_mode<synchronous>, transform_indices = @transform_3, window_bounds = array<i64: 16, 16>}, {transform_indices = @transform_4, window_bounds = array<i64: 1, 32, 32>}, {transform_indices = @transform_5, window_bounds = array<i64: 1, 32, 32>}, {transform_indices = @transform_6, window_bounds = array<i64: 1, 32, 32>}, {transform_indices = @transform_7, window_bounds = array<i64: 1, 1, 32>}, {transform_indices = @transform_8, window_bounds = array<i64: 1, 1, 32>}, {transform_indices = @transform_9, window_bounds = array<i64: 1, 1, 32>}, {transform_indices = @transform_10, window_bounds = array<i64: 1, 32, 32>}, {transform_indices = @transform_11, window_bounds = array<i64: 1, 1, 32>}, {transform_indices = @transform_12, window_bounds = array<i64: 1, 1, 32>}, {transform_indices = @transform_13, window_bounds = array<i64: 1, 1, 32>}, {transform_indices = @transform_14, window_bounds = array<i64: 1, 32, 512>}, {transform_indices = @transform_15, window_bounds = array<i64: 1, 1, 512>}, {transform_indices = @transform_16, window_bounds = array<i64: 1, 512, 32>}, {transform_indices = @transform_17, window_bounds = array<i64: 1, 1, 32>}, {transform_indices = @transform_18, window_bounds = array<i64: 1, 1, 32>}, {transform_indices = @transform_19, window_bounds = array<i64: 1, 1, 32>}, {pipeline_mode = #tpu.pipeline_mode<synchronous>, transform_indices = @transform_20, window_bounds = array<i64: 16, 32>}]} {
    %c0_i32 = arith.constant 0 : i32
    %0 = arith.cmpi eq, %arg0, %c0_i32 : i32
    %c0_i32_0 = arith.constant 0 : i32
    %1 = arith.cmpi eq, %arg1, %c0_i32_0 : i32
    %2 = arith.andi %0, %1 : i1
    %3 = arith.extui %2 : i1 to i32
    %c0_i32_1 = arith.constant 0 : i32
    %4 = arith.cmpi ne, %3, %c0_i32_1 : i32
    scf.if %4 {
      %c0_21 = arith.constant 0 : index
      %c0_22 = arith.constant 0 : index
      %29 = vector.load %arg2[%c0_21, %c0_22] : memref<16x16xf32, #tpu.memory_space<vmem>>, vector<16x16xf32>
      %c0_23 = arith.constant 0 : index
      %c0_24 = arith.constant 0 : index
      %30 = vector.load %arg3[%c0_23, %c0_24] : memref<16x32xf32, #tpu.memory_space<vmem>>, vector<16x32xf32>
      %cst_25 = arith.constant dense<0.000000e+00> : vector<16x32xf32>
      %31 = tpu.matmul %29, %30, %cst_25 {dimension_numbers = #tpu.dot_dimension_numbers<[1], [0], [0], [1], [0, 0, 1, 1], [], []>} : vector<16x16xf32>, vector<16x32xf32>, vector<16x32xf32> -> vector<16x32xf32>
      %c0_26 = arith.constant 0 : index
      %c0_27 = arith.constant 0 : index
      %32 = vector.load %arg4[%c0_26, %c0_27] : memref<16x32xf32, #tpu.memory_space<vmem>>, vector<16x32xf32>
      %33 = arith.addf %31, %32 : vector<16x32xf32>
      %c0_28 = arith.constant 0 : index
      %c0_29 = arith.constant 0 : index
      %34 = vector.load %arg23[%c0_28, %c0_29] : memref<16x32xf32, #tpu.memory_space<vmem>>, vector<16x32xf32>
      tpu.vector_store %arg23[%c0_28, %c0_29], %33 {strides = array<i32>} : memref<16x32xf32, #tpu.memory_space<vmem>>, vector<16x32xf32>,
    } else {
    }
    %c0_i32_2 = arith.constant 0 : i32
    %5 = arith.cmpi eq, %arg1, %c0_i32_2 : i32
    %6 = arith.extui %5 : i1 to i32
    %c0_i32_3 = arith.constant 0 : i32
    %7 = arith.cmpi ne, %6, %c0_i32_3 : i32
    scf.if %7 {
      %c0_21 = arith.constant 0 : index
      %c0_22 = arith.constant 0 : index
      %29 = vector.load %arg23[%c0_21, %c0_22] : memref<16x32xf32, #tpu.memory_space<vmem>>, vector<16x32xf32>
      %c0_23 = arith.constant 0 : index
      %c0_24 = arith.constant 0 : index
      %c0_25 = arith.constant 0 : index
      %30 = vector.load %arg6[%c0_23, %c0_24, %c0_25] : memref<1x32x32xf32, #tpu.memory_space<vmem>>, vector<1x32x32xf32>
      %31 = vector.shape_cast %30 : vector<1x32x32xf32> to vector<32x32xf32>
      %cst_26 = arith.constant dense<0.000000e+00> : vector<16x32xf32>
      %32 = tpu.matmul %29, %31, %cst_26 {dimension_numbers = #tpu.dot_dimension_numbers<[1], [0], [0], [1], [0, 0, 1, 1], [], []>} : vector<16x32xf32>, vector<32x32xf32>, vector<16x32xf32> -> vector<16x32xf32>
      %c0_27 = arith.constant 0 : index
      %c0_28 = arith.constant 0 : index
      %c0_29 = arith.constant 0 : index
      %33 = vector.load %arg9[%c0_27, %c0_28, %c0_29] : memref<1x1x32xf32, #tpu.memory_space<vmem>>, vector<1x1x32xf32>
      %34 = vector.shape_cast %33 : vector<1x1x32xf32> to vector<1x32xf32>
      %35 = vector.broadcast %34 : vector<1x32xf32> to vector<16x32xf32>
      %36 = arith.addf %32, %35 : vector<16x32xf32>
      %c0_30 = arith.constant 0 : index
      %c0_31 = arith.constant 0 : index
      %c0_32 = arith.constant 0 : index
      %37 = vector.load %arg7[%c0_30, %c0_31, %c0_32] : memref<1x32x32xf32, #tpu.memory_space<vmem>>, vector<1x32x32xf32>
      %38 = vector.shape_cast %37 : vector<1x32x32xf32> to vector<32x32xf32>
      %cst_33 = arith.constant dense<0.000000e+00> : vector<16x32xf32>
      %39 = tpu.matmul %29, %38, %cst_33 {dimension_numbers = #tpu.dot_dimension_numbers<[1], [0], [0], [1], [0, 0, 1, 1], [], []>} : vector<16x32xf32>, vector<32x32xf32>, vector<16x32xf32> -> vector<16x32xf32>
      %c0_34 = arith.constant 0 : index
      %c0_35 = arith.constant 0 : index
      %c0_36 = arith.constant 0 : index
      %40 = vector.load %arg10[%c0_34, %c0_35, %c0_36] : memref<1x1x32xf32, #tpu.memory_space<vmem>>, vector<1x1x32xf32>
      %41 = vector.shape_cast %40 : vector<1x1x32xf32> to vector<1x32xf32>
      %42 = vector.broadcast %41 : vector<1x32xf32> to vector<16x32xf32>
      %43 = arith.addf %39, %42 : vector<16x32xf32>
      %c0_37 = arith.constant 0 : index
      %c0_38 = arith.constant 0 : index
      %c0_39 = arith.constant 0 : index
      %44 = vector.load %arg8[%c0_37, %c0_38, %c0_39] : memref<1x32x32xf32, #tpu.memory_space<vmem>>, vector<1x32x32xf32>
      %45 = vector.shape_cast %44 : vector<1x32x32xf32> to vector<32x32xf32>
      %cst_40 = arith.constant dense<0.000000e+00> : vector<16x32xf32>
      %46 = tpu.matmul %29, %45, %cst_40 {dimension_numbers = #tpu.dot_dimension_numbers<[1], [0], [0], [1], [0, 0, 1, 1], [], []>} : vector<16x32xf32>, vector<32x32xf32>, vector<16x32xf32> -> vector<16x32xf32>
      %c0_41 = arith.constant 0 : index
      %c0_42 = arith.constant 0 : index
      %c0_43 = arith.constant 0 : index
      %47 = vector.load %arg11[%c0_41, %c0_42, %c0_43] : memref<1x1x32xf32, #tpu.memory_space<vmem>>, vector<1x1x32xf32>
      %48 = vector.shape_cast %47 : vector<1x1x32xf32> to vector<1x32xf32>
      %49 = vector.broadcast %48 : vector<1x32xf32> to vector<16x32xf32>
      %50 = arith.addf %46, %49 : vector<16x32xf32>
      %c0_44 = arith.constant 0 : index
      %c0_45 = arith.constant 0 : index
      %51 = vector.load %arg5[%c0_44, %c0_45] : memref<16x16xf32, #tpu.memory_space<vmem>>, vector<16x16xf32>
      %52 = vector.extract_strided_slice %36 {offsets = [0, 0], sizes = [16, 8], strides = [1, 1]} : vector<16x32xf32> to vector<16x8xf32>
      %53 = vector.extract_strided_slice %43 {offsets = [0, 0], sizes = [16, 8], strides = [1, 1]} : vector<16x32xf32> to vector<16x8xf32>
      %54 = vector.extract_strided_slice %50 {offsets = [0, 0], sizes = [16, 8], strides = [1, 1]} : vector<16x32xf32> to vector<16x8xf32>
      %cst_46 = arith.constant dense<0.000000e+00> : vector<16x16xf32>
      %55 = tpu.matmul %52, %53, %cst_46 {dimension_numbers = #tpu.dot_dimension_numbers<[1], [1], [0], [0], [0, 0, 1, 0], [], []>} : vector<16x8xf32>, vector<16x8xf32>, vector<16x16xf32> -> vector<16x16xf32>
      %56 = arith.addf %55, %51 : vector<16x16xf32>
      %cst_47 = arith.constant dense<0xFF800000> : vector<16xf32>
      %57 = vector.multi_reduction <maximumf>, %56, %cst_47 [1] : vector<16x16xf32> to vector<16xf32>
      %58 = vector.shape_cast %57 : vector<16xf32> to vector<16x1xf32>
      %59 = vector.broadcast %58 : vector<16x1xf32> to vector<16x16xf32>
      %60 = arith.subf %56, %59 : vector<16x16xf32>
      %61 = math.exp %60 : vector<16x16xf32>
      %cst_48 = arith.constant dense<0.000000e+00> : vector<16xf32>
      %62 = vector.multi_reduction <add>, %61, %cst_48 [1] : vector<16x16xf32> to vector<16xf32>
      %63 = vector.shape_cast %62 : vector<16xf32> to vector<16x1xf32>
      %64 = tpu.reciprocal %63 {approx = true} : vector<16x1xf32> -> vector<16x1xf32>
      %65 = vector.broadcast %64 : vector<16x1xf32> to vector<16x16xf32>
      %66 = arith.mulf %61, %65 : vector<16x16xf32>
      %cst_49 = arith.constant dense<0.000000e+00> : vector<16x8xf32>
      %67 = tpu.matmul %66, %54, %cst_49 {dimension_numbers = #tpu.dot_dimension_numbers<[1], [0], [0], [1], [0, 0, 1, 1], [], []>} : vector<16x16xf32>, vector<16x8xf32>, vector<16x8xf32> -> vector<16x8xf32>
      %c0_50 = arith.constant 0 : index
      %c0_51 = arith.constant 0 : index
      %68 = vector.load %arg26[%c0_50, %c0_51] : memref<16x32xf32, #tpu.memory_space<vmem>>, vector<16x8xf32>
      tpu.vector_store %arg26[%c0_50, %c0_51], %67 {strides = array<i32>} : memref<16x32xf32, #tpu.memory_space<vmem>>, vector<16x8xf32>,
      %69 = vector.extract_strided_slice %36 {offsets = [0, 8], sizes = [16, 8], strides = [1, 1]} : vector<16x32xf32> to vector<16x8xf32>
      %70 = vector.extract_strided_slice %43 {offsets = [0, 8], sizes = [16, 8], strides = [1, 1]} : vector<16x32xf32> to vector<16x8xf32>
      %71 = vector.extract_strided_slice %50 {offsets = [0, 8], sizes = [16, 8], strides = [1, 1]} : vector<16x32xf32> to vector<16x8xf32>
      %cst_52 = arith.constant dense<0.000000e+00> : vector<16x16xf32>
      %72 = tpu.matmul %69, %70, %cst_52 {dimension_numbers = #tpu.dot_dimension_numbers<[1], [1], [0], [0], [0, 0, 1, 0], [], []>} : vector<16x8xf32>, vector<16x8xf32>, vector<16x16xf32> -> vector<16x16xf32>
      %73 = arith.addf %72, %51 : vector<16x16xf32>
      %cst_53 = arith.constant dense<0xFF800000> : vector<16xf32>
      %74 = vector.multi_reduction <maximumf>, %73, %cst_53 [1] : vector<16x16xf32> to vector<16xf32>
      %75 = vector.shape_cast %74 : vector<16xf32> to vector<16x1xf32>
      %76 = vector.broadcast %75 : vector<16x1xf32> to vector<16x16xf32>
      %77 = arith.subf %73, %76 : vector<16x16xf32>
      %78 = math.exp %77 : vector<16x16xf32>
      %cst_54 = arith.constant dense<0.000000e+00> : vector<16xf32>
      %79 = vector.multi_reduction <add>, %78, %cst_54 [1] : vector<16x16xf32> to vector<16xf32>
      %80 = vector.shape_cast %79 : vector<16xf32> to vector<16x1xf32>
      %81 = tpu.reciprocal %80 {approx = true} : vector<16x1xf32> -> vector<16x1xf32>
      %82 = vector.broadcast %81 : vector<16x1xf32> to vector<16x16xf32>
      %83 = arith.mulf %78, %82 : vector<16x16xf32>
      %cst_55 = arith.constant dense<0.000000e+00> : vector<16x8xf32>
      %84 = tpu.matmul %83, %71, %cst_55 {dimension_numbers = #tpu.dot_dimension_numbers<[1], [0], [0], [1], [0, 0, 1, 1], [], []>} : vector<16x16xf32>, vector<16x8xf32>, vector<16x8xf32> -> vector<16x8xf32>
      %c0_56 = arith.constant 0 : index
      %c8 = arith.constant 8 : index
      %85 = vector.load %arg26[%c0_56, %c8] : memref<16x32xf32, #tpu.memory_space<vmem>>, vector<16x8xf32>
      tpu.vector_store %arg26[%c0_56, %c8], %84 {strides = array<i32>} : memref<16x32xf32, #tpu.memory_space<vmem>>, vector<16x8xf32>,
      %86 = vector.extract_strided_slice %36 {offsets = [0, 16], sizes = [16, 8], strides = [1, 1]} : vector<16x32xf32> to vector<16x8xf32>
      %87 = vector.extract_strided_slice %43 {offsets = [0, 16], sizes = [16, 8], strides = [1, 1]} : vector<16x32xf32> to vector<16x8xf32>
      %88 = vector.extract_strided_slice %50 {offsets = [0, 16], sizes = [16, 8], strides = [1, 1]} : vector<16x32xf32> to vector<16x8xf32>
      %cst_57 = arith.constant dense<0.000000e+00> : vector<16x16xf32>
      %89 = tpu.matmul %86, %87, %cst_57 {dimension_numbers = #tpu.dot_dimension_numbers<[1], [1], [0], [0], [0, 0, 1, 0], [], []>} : vector<16x8xf32>, vector<16x8xf32>, vector<16x16xf32> -> vector<16x16xf32>
      %90 = arith.addf %89, %51 : vector<16x16xf32>
      %cst_58 = arith.constant dense<0xFF800000> : vector<16xf32>
      %91 = vector.multi_reduction <maximumf>, %90, %cst_58 [1] : vector<16x16xf32> to vector<16xf32>
      %92 = vector.shape_cast %91 : vector<16xf32> to vector<16x1xf32>
      %93 = vector.broadcast %92 : vector<16x1xf32> to vector<16x16xf32>
      %94 = arith.subf %90, %93 : vector<16x16xf32>
      %95 = math.exp %94 : vector<16x16xf32>
      %cst_59 = arith.constant dense<0.000000e+00> : vector<16xf32>
      %96 = vector.multi_reduction <add>, %95, %cst_59 [1] : vector<16x16xf32> to vector<16xf32>
      %97 = vector.shape_cast %96 : vector<16xf32> to vector<16x1xf32>
      %98 = tpu.reciprocal %97 {approx = true} : vector<16x1xf32> -> vector<16x1xf32>
      %99 = vector.broadcast %98 : vector<16x1xf32> to vector<16x16xf32>
      %100 = arith.mulf %95, %99 : vector<16x16xf32>
      %cst_60 = arith.constant dense<0.000000e+00> : vector<16x8xf32>
      %101 = tpu.matmul %100, %88, %cst_60 {dimension_numbers = #tpu.dot_dimension_numbers<[1], [0], [0], [1], [0, 0, 1, 1], [], []>} : vector<16x16xf32>, vector<16x8xf32>, vector<16x8xf32> -> vector<16x8xf32>
      %c0_61 = arith.constant 0 : index
      %c16 = arith.constant 16 : index
      %102 = vector.load %arg26[%c0_61, %c16] : memref<16x32xf32, #tpu.memory_space<vmem>>, vector<16x8xf32>
      tpu.vector_store %arg26[%c0_61, %c16], %101 {strides = array<i32>} : memref<16x32xf32, #tpu.memory_space<vmem>>, vector<16x8xf32>,
      %103 = vector.extract_strided_slice %36 {offsets = [0, 24], sizes = [16, 8], strides = [1, 1]} : vector<16x32xf32> to vector<16x8xf32>
      %104 = vector.extract_strided_slice %43 {offsets = [0, 24], sizes = [16, 8], strides = [1, 1]} : vector<16x32xf32> to vector<16x8xf32>
      %105 = vector.extract_strided_slice %50 {offsets = [0, 24], sizes = [16, 8], strides = [1, 1]} : vector<16x32xf32> to vector<16x8xf32>
      %cst_62 = arith.constant dense<0.000000e+00> : vector<16x16xf32>
      %106 = tpu.matmul %103, %104, %cst_62 {dimension_numbers = #tpu.dot_dimension_numbers<[1], [1], [0], [0], [0, 0, 1, 0], [], []>} : vector<16x8xf32>, vector<16x8xf32>, vector<16x16xf32> -> vector<16x16xf32>
      %107 = arith.addf %106, %51 : vector<16x16xf32>
      %cst_63 = arith.constant dense<0xFF800000> : vector<16xf32>
      %108 = vector.multi_reduction <maximumf>, %107, %cst_63 [1] : vector<16x16xf32> to vector<16xf32>
      %109 = vector.shape_cast %108 : vector<16xf32> to vector<16x1xf32>
      %110 = vector.broadcast %109 : vector<16x1xf32> to vector<16x16xf32>
      %111 = arith.subf %107, %110 : vector<16x16xf32>
      %112 = math.exp %111 : vector<16x16xf32>
      %cst_64 = arith.constant dense<0.000000e+00> : vector<16xf32>
      %113 = vector.multi_reduction <add>, %112, %cst_64 [1] : vector<16x16xf32> to vector<16xf32>
      %114 = vector.shape_cast %113 : vector<16xf32> to vector<16x1xf32>
      %115 = tpu.reciprocal %114 {approx = true} : vector<16x1xf32> -> vector<16x1xf32>
      %116 = vector.broadcast %115 : vector<16x1xf32> to vector<16x16xf32>
      %117 = arith.mulf %112, %116 : vector<16x16xf32>
      %cst_65 = arith.constant dense<0.000000e+00> : vector<16x8xf32>
      %118 = tpu.matmul %117, %105, %cst_65 {dimension_numbers = #tpu.dot_dimension_numbers<[1], [0], [0], [1], [0, 0, 1, 1], [], []>} : vector<16x16xf32>, vector<16x8xf32>, vector<16x8xf32> -> vector<16x8xf32>
      %c0_66 = arith.constant 0 : index
      %c24 = arith.constant 24 : index
      %119 = vector.load %arg26[%c0_66, %c24] : memref<16x32xf32, #tpu.memory_space<vmem>>, vector<16x8xf32>
      tpu.vector_store %arg26[%c0_66, %c24], %118 {strides = array<i32>} : memref<16x32xf32, #tpu.memory_space<vmem>>, vector<16x8xf32>,
      %c0_67 = arith.constant 0 : index
      %c0_68 = arith.constant 0 : index
      %120 = vector.load %arg26[%c0_67, %c0_68] : memref<16x32xf32, #tpu.memory_space<vmem>>, vector<16x32xf32>
      %c0_69 = arith.constant 0 : index
      %c0_70 = arith.constant 0 : index
      %c0_71 = arith.constant 0 : index
      %121 = vector.load %arg12[%c0_69, %c0_70, %c0_71] : memref<1x32x32xf32, #tpu.memory_space<vmem>>, vector<1x32x32xf32>
      %122 = vector.shape_cast %121 : vector<1x32x32xf32> to vector<32x32xf32>
      %cst_72 = arith.constant dense<0.000000e+00> : vector<16x32xf32>
      %123 = tpu.matmul %120, %122, %cst_72 {dimension_numbers = #tpu.dot_dimension_numbers<[1], [0], [0], [1], [0, 0, 1, 1], [], []>} : vector<16x32xf32>, vector<32x32xf32>, vector<16x32xf32> -> vector<16x32xf32>
      %c0_73 = arith.constant 0 : index
      %c0_74 = arith.constant 0 : index
      %c0_75 = arith.constant 0 : index
      %124 = vector.load %arg13[%c0_73, %c0_74, %c0_75] : memref<1x1x32xf32, #tpu.memory_space<vmem>>, vector<1x1x32xf32>
      %125 = vector.shape_cast %124 : vector<1x1x32xf32> to vector<1x32xf32>
      %126 = vector.broadcast %125 : vector<1x32xf32> to vector<16x32xf32>
      %127 = arith.addf %123, %126 : vector<16x32xf32>
      %128 = arith.addf %29, %127 : vector<16x32xf32>
      %c0_76 = arith.constant 0 : index
      %c0_77 = arith.constant 0 : index
      %c0_78 = arith.constant 0 : index
      %129 = vector.load %arg14[%c0_76, %c0_77, %c0_78] : memref<1x1x32xf32, #tpu.memory_space<vmem>>, vector<1x1x32xf32>
      %130 = vector.shape_cast %129 : vector<1x1x32xf32> to vector<1x32xf32>
      %c0_79 = arith.constant 0 : index
      %c0_80 = arith.constant 0 : index
      %c0_81 = arith.constant 0 : index
      %131 = vector.load %arg15[%c0_79, %c0_80, %c0_81] : memref<1x1x32xf32, #tpu.memory_space<vmem>>, vector<1x1x32xf32>
      %132 = vector.shape_cast %131 : vector<1x1x32xf32> to vector<1x32xf32>
      %cst_82 = arith.constant dense<0.000000e+00> : vector<16xf32>
      %133 = vector.multi_reduction <add>, %128, %cst_82 [1] : vector<16x32xf32> to vector<16xf32>
      %134 = vector.shape_cast %133 : vector<16xf32> to vector<16x1xf32>
      %cst_83 = arith.constant 3.200000e+01 : f32
      %135 = vector.broadcast %cst_83 : f32 to vector<16x1xf32>
      %136 = arith.divf %134, %135 : vector<16x1xf32>
      %137 = vector.broadcast %136 : vector<16x1xf32> to vector<16x32xf32>
      %138 = arith.subf %128, %137 : vector<16x32xf32>
      %139 = vector.broadcast %136 : vector<16x1xf32> to vector<16x32xf32>
      %140 = arith.subf %128, %139 : vector<16x32xf32>
      %141 = arith.mulf %138, %140 : vector<16x32xf32>
      %cst_84 = arith.constant dense<0.000000e+00> : vector<16xf32>
      %142 = vector.multi_reduction <add>, %141, %cst_84 [1] : vector<16x32xf32> to vector<16xf32>
      %143 = vector.shape_cast %142 : vector<16xf32> to vector<16x1xf32>
      %cst_85 = arith.constant 3.200000e+01 : f32
      %144 = vector.broadcast %cst_85 : f32 to vector<16x1xf32>
      %145 = arith.divf %143, %144 : vector<16x1xf32>
      %146 = vector.broadcast %136 : vector<16x1xf32> to vector<16x32xf32>
      %147 = arith.subf %128, %146 : vector<16x32xf32>
      %cst_86 = arith.constant 9.99999974E-6 : f32
      %148 = vector.broadcast %cst_86 : f32 to vector<16x1xf32>
      %149 = arith.addf %145, %148 : vector<16x1xf32>
      %150 = math.rsqrt %149 : vector<16x1xf32>
      %151 = vector.broadcast %150 : vector<16x1xf32> to vector<16x32xf32>
      %152 = arith.mulf %147, %151 : vector<16x32xf32>
      %153 = vector.broadcast %130 : vector<1x32xf32> to vector<16x32xf32>
      %154 = arith.mulf %152, %153 : vector<16x32xf32>
      %155 = vector.broadcast %132 : vector<1x32xf32> to vector<16x32xf32>
      %156 = arith.addf %154, %155 : vector<16x32xf32>
      %c0_87 = arith.constant 0 : index
      %c0_88 = arith.constant 0 : index
      %157 = vector.load %arg24[%c0_87, %c0_88] : memref<16x32xf32, #tpu.memory_space<vmem>>, vector<16x32xf32>
      tpu.vector_store %arg24[%c0_87, %c0_88], %156 {strides = array<i32>} : memref<16x32xf32, #tpu.memory_space<vmem>>, vector<16x32xf32>,
      %cst_89 = arith.constant 0.000000e+00 : f32
      %158 = vector.broadcast %cst_89 : f32 to vector<16x32xf32>
      %c0_90 = arith.constant 0 : index
      %c0_91 = arith.constant 0 : index
      %159 = vector.load %arg25[%c0_90, %c0_91] : memref<16x32xf32, #tpu.memory_space<vmem>>, vector<16x32xf32>
      tpu.vector_store %arg25[%c0_90, %c0_91], %158 {strides = array<i32>} : memref<16x32xf32, #tpu.memory_space<vmem>>, vector<16x32xf32>,
    } else {
    }
    %c0 = arith.constant 0 : index
    %c0_4 = arith.constant 0 : index
    %8 = vector.load %arg24[%c0, %c0_4] : memref<16x32xf32, #tpu.memory_space<vmem>>, vector<16x32xf32>
    %9 = arith.truncf %8 : vector<16x32xf32> to vector<16x32xbf16>
    %c0_5 = arith.constant 0 : index
    %c0_6 = arith.constant 0 : index
    %c0_7 = arith.constant 0 : index
    %10 = vector.load %arg16[%c0_5, %c0_6, %c0_7] : memref<1x32x512xbf16, #tpu.memory_space<vmem>>, vector<1x32x512xbf16>
    %11 = vector.shape_cast %10 : vector<1x32x512xbf16> to vector<32x512xbf16>
    %cst = arith.constant dense<0.000000e+00> : vector<16x512xf32>
    %12 = tpu.matmul %9, %11, %cst {dimension_numbers = #tpu.dot_dimension_numbers<[1], [0], [0], [1], [0, 0, 1, 1], [], []>} : vector<16x32xbf16>, vector<32x512xbf16>, vector<16x512xf32> -> vector<16x512xf32>
    %c0_8 = arith.constant 0 : index
    %c0_9 = arith.constant 0 : index
    %c0_10 = arith.constant 0 : index
    %13 = vector.load %arg17[%c0_8, %c0_9, %c0_10] : memref<1x1x512xf32, #tpu.memory_space<vmem>>, vector<1x1x512xf32>
    %14 = vector.shape_cast %13 : vector<1x1x512xf32> to vector<1x512xf32>
    %15 = vector.broadcast %14 : vector<1x512xf32> to vector<16x512xf32>
    %16 = arith.addf %12, %15 : vector<16x512xf32>
    %cst_11 = arith.constant 0.000000e+00 : f32
    %17 = vector.broadcast %cst_11 : f32 to vector<16x512xf32>
    %18 = arith.maximumf %16, %17 : vector<16x512xf32>
    %c0_12 = arith.constant 0 : index
    %c0_13 = arith.constant 0 : index
    %19 = vector.load %arg25[%c0_12, %c0_13] : memref<16x32xf32, #tpu.memory_space<vmem>>, vector<16x32xf32>
    %20 = arith.truncf %18 : vector<16x512xf32> to vector<16x512xbf16>
    %c0_14 = arith.constant 0 : index
    %c0_15 = arith.constant 0 : index
    %c0_16 = arith.constant 0 : index
    %21 = vector.load %arg18[%c0_14, %c0_15, %c0_16] : memref<1x512x32xbf16, #tpu.memory_space<vmem>>, vector<1x512x32xbf16>
    %22 = vector.shape_cast %21 : vector<1x512x32xbf16> to vector<512x32xbf16>
    %cst_17 = arith.constant dense<0.000000e+00> : vector<16x32xf32>
    %23 = tpu.matmul %20, %22, %cst_17 {dimension_numbers = #tpu.dot_dimension_numbers<[1], [0], [0], [1], [0, 0, 1, 1], [], []>} : vector<16x512xbf16>, vector<512x32xbf16>, vector<16x32xf32> -> vector<16x32xf32>
    %24 = arith.addf %19, %23 : vector<16x32xf32>
    %c0_18 = arith.constant 0 : index
    %c0_19 = arith.constant 0 : index
    %25 = vector.load %arg25[%c0_18, %c0_19] : memref<16x32xf32, #tpu.memory_space<vmem>>, vector<16x32xf32>
    tpu.vector_store %arg25[%c0_18, %c0_19], %24 {strides = array<i32>} : memref<16x32xf32, #tpu.memory_space<vmem>>, vector<16x32xf32>,
    %c3_i32 = arith.constant 3 : i32
    %26 = arith.cmpi eq, %arg1, %c3_i32 : i32
    %27 = arith.extui %26 : i1 to i32
    %c0_i32_20 = arith.constant 0 : i32
    %28 = arith.cmpi ne, %27, %c0_i32_20 : i32
    scf.if %28 {
      %c0_21 = arith.constant 0 : index
      %c0_22 = arith.constant 0 : index
      %29 = vector.load %arg24[%c0_21, %c0_22] : memref<16x32xf32, #tpu.memory_space<vmem>>, vector<16x32xf32>
      %c0_23 = arith.constant 0 : index
      %c0_24 = arith.constant 0 : index
      %30 = vector.load %arg25[%c0_23, %c0_24] : memref<16x32xf32, #tpu.memory_space<vmem>>, vector<16x32xf32>
      %31 = arith.addf %29, %30 : vector<16x32xf32>
      %c0_25 = arith.constant 0 : index
      %c0_26 = arith.constant 0 : index
      %c0_27 = arith.constant 0 : index
      %32 = vector.load %arg19[%c0_25, %c0_26, %c0_27] : memref<1x1x32xf32, #tpu.memory_space<vmem>>, vector<1x1x32xf32>
      %33 = vector.shape_cast %32 : vector<1x1x32xf32> to vector<1x32xf32>
      %34 = vector.broadcast %33 : vector<1x32xf32> to vector<16x32xf32>
      %35 = arith.addf %31, %34 : vector<16x32xf32>
      %c0_28 = arith.constant 0 : index
      %c0_29 = arith.constant 0 : index
      %c0_30 = arith.constant 0 : index
      %36 = vector.load %arg20[%c0_28, %c0_29, %c0_30] : memref<1x1x32xf32, #tpu.memory_space<vmem>>, vector<1x1x32xf32>
      %37 = vector.shape_cast %36 : vector<1x1x32xf32> to vector<1x32xf32>
      %c0_31 = arith.constant 0 : index
      %c0_32 = arith.constant 0 : index
      %c0_33 = arith.constant 0 : index
      %38 = vector.load %arg21[%c0_31, %c0_32, %c0_33] : memref<1x1x32xf32, #tpu.memory_space<vmem>>, vector<1x1x32xf32>
      %39 = vector.shape_cast %38 : vector<1x1x32xf32> to vector<1x32xf32>
      %cst_34 = arith.constant dense<0.000000e+00> : vector<16xf32>
      %40 = vector.multi_reduction <add>, %35, %cst_34 [1] : vector<16x32xf32> to vector<16xf32>
      %41 = vector.shape_cast %40 : vector<16xf32> to vector<16x1xf32>
      %cst_35 = arith.constant 3.200000e+01 : f32
      %42 = vector.broadcast %cst_35 : f32 to vector<16x1xf32>
      %43 = arith.divf %41, %42 : vector<16x1xf32>
      %44 = vector.broadcast %43 : vector<16x1xf32> to vector<16x32xf32>
      %45 = arith.subf %35, %44 : vector<16x32xf32>
      %46 = vector.broadcast %43 : vector<16x1xf32> to vector<16x32xf32>
      %47 = arith.subf %35, %46 : vector<16x32xf32>
      %48 = arith.mulf %45, %47 : vector<16x32xf32>
      %cst_36 = arith.constant dense<0.000000e+00> : vector<16xf32>
      %49 = vector.multi_reduction <add>, %48, %cst_36 [1] : vector<16x32xf32> to vector<16xf32>
      %50 = vector.shape_cast %49 : vector<16xf32> to vector<16x1xf32>
      %cst_37 = arith.constant 3.200000e+01 : f32
      %51 = vector.broadcast %cst_37 : f32 to vector<16x1xf32>
      %52 = arith.divf %50, %51 : vector<16x1xf32>
      %53 = vector.broadcast %43 : vector<16x1xf32> to vector<16x32xf32>
      %54 = arith.subf %35, %53 : vector<16x32xf32>
      %cst_38 = arith.constant 9.99999974E-6 : f32
      %55 = vector.broadcast %cst_38 : f32 to vector<16x1xf32>
      %56 = arith.addf %52, %55 : vector<16x1xf32>
      %57 = math.rsqrt %56 : vector<16x1xf32>
      %58 = vector.broadcast %57 : vector<16x1xf32> to vector<16x32xf32>
      %59 = arith.mulf %54, %58 : vector<16x32xf32>
      %60 = vector.broadcast %37 : vector<1x32xf32> to vector<16x32xf32>
      %61 = arith.mulf %59, %60 : vector<16x32xf32>
      %62 = vector.broadcast %39 : vector<1x32xf32> to vector<16x32xf32>
      %63 = arith.addf %61, %62 : vector<16x32xf32>
      %c0_39 = arith.constant 0 : index
      %c0_40 = arith.constant 0 : index
      %64 = vector.load %arg23[%c0_39, %c0_40] : memref<16x32xf32, #tpu.memory_space<vmem>>, vector<16x32xf32>
      tpu.vector_store %arg23[%c0_39, %c0_40], %63 {strides = array<i32>} : memref<16x32xf32, #tpu.memory_space<vmem>>, vector<16x32xf32>,
      %c2_i32 = arith.constant 2 : i32
      %65 = arith.cmpi eq, %arg0, %c2_i32 : i32
      %66 = arith.extui %65 : i1 to i32
      %c0_i32_41 = arith.constant 0 : i32
      %67 = arith.cmpi ne, %66, %c0_i32_41 : i32
      scf.if %67 {
        %c0_42 = arith.constant 0 : index
        %c0_43 = arith.constant 0 : index
        %68 = vector.load %arg22[%c0_42, %c0_43] : memref<16x32xf32, #tpu.memory_space<vmem>>, vector<16x32xf32>
        tpu.vector_store %arg22[%c0_42, %c0_43], %63 {strides = array<i32>} : memref<16x32xf32, #tpu.memory_space<vmem>>, vector<16x32xf32>,
      } else {
      }
    } else {
    }
    return
  }
  func.func @transform_0(%arg0: i32, %arg1: i32) -> (i32, i32) {
    %c0_i32 = arith.constant 0 : i32
    %c0_i32_0 = arith.constant 0 : i32
    %c0_i32_1 = arith.constant 0 : i32
    return %c0_i32, %c0_i32_0 : i32, i32
  }
  func.func @transform_1(%arg0: i32, %arg1: i32) -> (i32, i32) {
    %c0_i32 = arith.constant 0 : i32
    %c0_i32_0 = arith.constant 0 : i32
    %c0_i32_1 = arith.constant 0 : i32
    return %c0_i32, %c0_i32_0 : i32, i32
  }
  func.func @transform_2(%arg0: i32, %arg1: i32) -> (i32, i32) {
    %c0_i32 = arith.constant 0 : i32
    %c0_i32_0 = arith.constant 0 : i32
    %c0_i32_1 = arith.constant 0 : i32
    return %c0_i32, %c0_i32_0 : i32, i32
  }
  func.func @transform_3(%arg0: i32, %arg1: i32) -> (i32, i32) {
    %c0_i32 = arith.constant 0 : i32
    %c0_i32_0 = arith.constant 0 : i32
    %c0_i32_1 = arith.constant 0 : i32
    return %c0_i32, %c0_i32_0 : i32, i32
  }
  func.func @transform_4(%arg0: i32, %arg1: i32) -> (i32, i32, i32) {
    %c0_i32 = arith.constant 0 : i32
    %c0_i32_0 = arith.constant 0 : i32
    %c0_i32_1 = arith.constant 0 : i32
    return %arg0, %c0_i32, %c0_i32_0 : i32, i32, i32
  }
  func.func @transform_5(%arg0: i32, %arg1: i32) -> (i32, i32, i32) {
    %c0_i32 = arith.constant 0 : i32
    %c0_i32_0 = arith.constant 0 : i32
    %c0_i32_1 = arith.constant 0 : i32
    return %arg0, %c0_i32, %c0_i32_0 : i32, i32, i32
  }
  func.func @transform_6(%arg0: i32, %arg1: i32) -> (i32, i32, i32) {
    %c0_i32 = arith.constant 0 : i32
    %c0_i32_0 = arith.constant 0 : i32
    %c0_i32_1 = arith.constant 0 : i32
    return %arg0, %c0_i32, %c0_i32_0 : i32, i32, i32
  }
  func.func @transform_7(%arg0: i32, %arg1: i32) -> (i32, i32, i32) {
    %c0_i32 = arith.constant 0 : i32
    %c0_i32_0 = arith.constant 0 : i32
    %c0_i32_1 = arith.constant 0 : i32
    return %arg0, %c0_i32, %c0_i32_0 : i32, i32, i32
  }
  func.func @transform_8(%arg0: i32, %arg1: i32) -> (i32, i32, i32) {
    %c0_i32 = arith.constant 0 : i32
    %c0_i32_0 = arith.constant 0 : i32
    %c0_i32_1 = arith.constant 0 : i32
    return %arg0, %c0_i32, %c0_i32_0 : i32, i32, i32
  }
  func.func @transform_9(%arg0: i32, %arg1: i32) -> (i32, i32, i32) {
    %c0_i32 = arith.constant 0 : i32
    %c0_i32_0 = arith.constant 0 : i32
    %c0_i32_1 = arith.constant 0 : i32
    return %arg0, %c0_i32, %c0_i32_0 : i32, i32, i32
  }
  func.func @transform_10(%arg0: i32, %arg1: i32) -> (i32, i32, i32) {
    %c0_i32 = arith.constant 0 : i32
    %c0_i32_0 = arith.constant 0 : i32
    %c0_i32_1 = arith.constant 0 : i32
    return %arg0, %c0_i32, %c0_i32_0 : i32, i32, i32
  }
  func.func @transform_11(%arg0: i32, %arg1: i32) -> (i32, i32, i32) {
    %c0_i32 = arith.constant 0 : i32
    %c0_i32_0 = arith.constant 0 : i32
    %c0_i32_1 = arith.constant 0 : i32
    return %arg0, %c0_i32, %c0_i32_0 : i32, i32, i32
  }
  func.func @transform_12(%arg0: i32, %arg1: i32) -> (i32, i32, i32) {
    %c0_i32 = arith.constant 0 : i32
    %c0_i32_0 = arith.constant 0 : i32
    %c0_i32_1 = arith.constant 0 : i32
    return %arg0, %c0_i32, %c0_i32_0 : i32, i32, i32
  }
  func.func @transform_13(%arg0: i32, %arg1: i32) -> (i32, i32, i32) {
    %c0_i32 = arith.constant 0 : i32
    %c0_i32_0 = arith.constant 0 : i32
    %c0_i32_1 = arith.constant 0 : i32
    return %arg0, %c0_i32, %c0_i32_0 : i32, i32, i32
  }
  func.func @transform_14(%arg0: i32, %arg1: i32) -> (i32, i32, i32) {
    %c0_i32 = arith.constant 0 : i32
    %c0_i32_0 = arith.constant 0 : i32
    return %arg0, %c0_i32, %arg1 : i32, i32, i32
  }
  func.func @transform_15(%arg0: i32, %arg1: i32) -> (i32, i32, i32) {
    %c0_i32 = arith.constant 0 : i32
    %c0_i32_0 = arith.constant 0 : i32
    return %arg0, %c0_i32, %arg1 : i32, i32, i32
  }
  func.func @transform_16(%arg0: i32, %arg1: i32) -> (i32, i32, i32) {
    %c0_i32 = arith.constant 0 : i32
    %c0_i32_0 = arith.constant 0 : i32
    return %arg0, %arg1, %c0_i32 : i32, i32, i32
  }
  func.func @transform_17(%arg0: i32, %arg1: i32) -> (i32, i32, i32) {
    %c0_i32 = arith.constant 0 : i32
    %c0_i32_0 = arith.constant 0 : i32
    %c0_i32_1 = arith.constant 0 : i32
    return %arg0, %c0_i32, %c0_i32_0 : i32, i32, i32
  }
  func.func @transform_18(%arg0: i32, %arg1: i32) -> (i32, i32, i32) {
    %c0_i32 = arith.constant 0 : i32
    %c0_i32_0 = arith.constant 0 : i32
    %c0_i32_1 = arith.constant 0 : i32
    return %arg0, %c0_i32, %c0_i32_0 : i32, i32, i32
  }
  func.func @transform_19(%arg0: i32, %arg1: i32) -> (i32, i32, i32) {
    %c0_i32 = arith.constant 0 : i32
    %c0_i32_0 = arith.constant 0 : i32
    %c0_i32_1 = arith.constant 0 : i32
    return %arg0, %c0_i32, %c0_i32_0 : i32, i32, i32
  }
  func.func @transform_20(%arg0: i32, %arg1: i32) -> (i32, i32) {
    %c0_i32 = arith.constant 0 : i32
    %c0_i32_0 = arith.constant 0 : i32
    %c0_i32_1 = arith.constant 0 : i32
    return %c0_i32, %c0_i32_0 : i32, i32
  }
}

</mosaic_0001>

<bundles_post_ra>
// kernel: tpu_custom_call.1
= control target key start
LH: loop header
LB: loop body
LE: loop exit
PB: predicated region body
PF: predicated region fallthrough
CT: control target
= control target key end

     0   :  { %s4385_s0 = inlined_call_operand.vmem [shape: f32[16,16], index: 0, kind: input, shape index: {}]   ;;  %s4386_s1 = inlined_call_operand.vmem [shape: f32[16,32], index: 1, kind: input, shape index: {}]   ;;  %s4387_s2 = inlined_call_operand.vmem [shape: f32[16,32], index: 2, kind: input, shape index: {}]   ;;  %s4388_s3 = inlined_call_operand.vmem [shape: f32[16,16], index: 3, kind: input, shape index: {}]   ;;  %s4389_s4 = inlined_call_operand.vmem [shape: f32[3,32,32], index: 4, kind: input, shape index: {}]   ;;  %s4390_s5 = inlined_call_operand.vmem [shape: f32[3,32,32], index: 5, kind: input, shape index: {}]   ;;  %s4391_s6 = inlined_call_operand.vmem [shape: f32[3,32,32], index: 6, kind: input, shape index: {}]   ;;  %s4392_s7 = inlined_call_operand.vmem [shape: f32[3,1,32], index: 7, kind: input, shape index: {}]   ;;  %s4393_s8 = inlined_call_operand.vmem [shape: f32[3,1,32], index: 8, kind: input, shape index: {}]   ;;  %s4394_s9 = inlined_call_operand.vmem [shape: f32[3,1,32], index: 9, kind: input, shape index: {}]   ;;  %s4395_s10 = inlined_call_operand.vmem [shape: f32[3,32,32], index: 10, kind: input, shape index: {}]   ;;  %s4396_s11 = inlined_call_operand.vmem [shape: f32[3,1,32], index: 11, kind: input, shape index: {}]   ;;  %s4397_s12 = inlined_call_operand.vmem [shape: f32[3,1,32], index: 12, kind: input, shape index: {}]   ;;  %s4398_s13 = inlined_call_operand.vmem [shape: f32[3,1,32], index: 13, kind: input, shape index: {}]   ;;  %s4399_s14 = inlined_call_operand.vmem [shape: bf16[3,32,2048], index: 14, kind: input, shape index: {}]   ;;  %s4400_s15 = inlined_call_operand.vmem [shape: f32[3,1,2048], index: 15, kind: input, shape index: {}]   ;;  %s4401_s16 = inlined_call_operand.vmem [shape: bf16[3,2048,32], index: 16, kind: input, shape index: {}]   ;;  %s4402_s17 = inlined_call_operand.vmem [shape: f32[3,1,32], index: 17, kind: input, shape index: {}]   ;;  %s4403_s18 = inlined_call_operand.vmem [shape: f32[3,1,32], index: 18, kind: input, shape index: {}]   ;;  %s4404_s19 = inlined_call_operand.vmem [shape: f32[3,1,32], index: 19, kind: input, shape index: {}]   ;;  %s4405_s20 = inlined_call_operand.hbm [shape: f32[16,32], index: 20, kind: output, shape index: {}]  }
   0x1   :  { %4418 = sst [smem:[#allocation18_spill]] %s4385_s0 }
   0x2   :  { %4419 = sst [smem:[#allocation19_spill]] %s4386_s1 }
   0x3   :  { %4420 = sst [smem:[#allocation20_spill]] %s4387_s2 }
   0x4   :  { %4421 = sst [smem:[#allocation21_spill]] %s4388_s3 }
   0x5   :  { %4422 = sst [smem:[#allocation22_spill]] %s4389_s4 }
   0x6   :  { %4423 = sst [smem:[#allocation23_spill]] %s4390_s5 }
   0x7   :  { %4424 = sst [smem:[#allocation24_spill]] %s4391_s6 }
   0x8   :  { %4425 = sst [smem:[#allocation25_spill]] %s4395_s10 }
   0x9   :  { %4426 = sst [smem:[#allocation26_spill]] %s4396_s11 }
   0xa   :  { %4427 = sst [smem:[#allocation27_spill]] %s4397_s12 }
   0xb   :  { %4428 = sst [smem:[#allocation28_spill]] %s4398_s13 }
   0xc   :  { %4429 = sst [smem:[#allocation29_spill]] %s4399_s14 }
   0xd   :  { %4430 = sst [smem:[#allocation30_spill]] %s4400_s15 }
   0xe   :  { %4431 = sst [smem:[#allocation31_spill]] %s4401_s16 }
   0xf   :  { %4432 = sst [smem:[#allocation32_spill]] %s4402_s17 }
  0x10   :  { %4433 = sst [smem:[#allocation33_spill]] %s4403_s18 }
  0x11   :  { %4434 = sst [smem:[#allocation34_spill]] %s4404_s19 }
  0x12   :  { %4435 = sst [smem:[#allocation35_spill]] %s4405_s20 }
  0x13   :  { %25 = vsyncpa [#allocation8], 0  ;;  %s3902_s1 = smov 0   ;;  %s3904_s22 = smov 0  }
  0x14   :  { %s3906_s23 = smov 0   ;;  %s3908_s24 = smov 0  }
  0x15   :  { %s3910_s2 = smov 0   ;;  %s3912_s25 = smov 0  }
  0x16   :  { %s3914_s3 = smov 0  }
  0x17 LB: > { %4436 = sst [smem:[#allocation10_spill]] %s3764_s22  ;;  %s40_s27 = sadd.s32 1, %s3776_s2  ;;  %s3784_s3 = sphi %s3914_s3, %s31_s3   ;;  %s3780_s25 = sphi %s3912_s25, %s4490_s25   ;;  %s3776_s2 = sphi %s3910_s2, %s4489_s2   ;;  %s3772_s24 = sphi %s3908_s24, %s4488_s24   ;;  %s3768_s23 = sphi %s3906_s23, %s4487_s23   ;;  %s3764_s22 = sphi %s3904_s22, %s4486_s22   ;;  %s3760_s1 = sphi %s3902_s1, %s4485_s1  }
  0x18   : > { %4437 = sst [smem:[#allocation11_spill]] %s3776_s2  ;;  %p41_p0 = scmp.ge.s32.totalorder %s40_s27, 4 }
  0x19   : > { %4438 = sst [smem:[#allocation12_spill]] %s3780_s25  ;;  %s43_s28 = sadd.s32 1, %s3780_s25 }
  0x1a   : > { %4439 = sst [smem:[#allocation13_spill]] %s3784_s3  ;;  %p403_p1 = scmp.ne.s32.totalorder %s3764_s22, %s3760_s1 }
  0x1b   : > { %s4492_s27 = smov (%p41_p0, %s40_s27), 0  ;;  %s4494_s28 = smov (!%p41_p0, %s43_s28), %s3780_s25 }
  0x1c   : > { %4440 = sst [smem:[#allocation14_spill]] %s4492_s27  ;;  %p404_p2 = scmp.eq.s32.totalorder %s3784_s3, 0 }
  0x1d   : > { %p45_p3 = scmp.ge.s32.totalorder %s4494_s28, 3  ;;  %s392_s4 = ssub.s32 %s3776_s2, %s4492_s27 }
  0x1e   : > { %p405_p4 = por %p404_p2, %p403_p1  ;;  %s396_s0 = sadd.s32 1, %s3764_s22 }
  0x1f   : > { %s4496_s28 = smov (%p45_p3, %s4494_s28), 0  ;;  %p3110_p6 = scmp.ge.s32.totalorder %s3784_s3, 12 }
  0x20   : > { %4441 = sst [smem:[#allocation15_spill]] %s4496_s28  ;;  %s391_s29 = ssub.s32 %s3780_s25, %s4496_s28 }
  0x21   : > { %s393_s30 = sor.u32 %s392_s4, %s391_s29  ;;  %596 = sbr.rel (%p3110_p6) target bundleno = 54 (0x36), region = 32 }
  0x22   : > { %p394_p5 = scmp.eq.s32.totalorder %s393_s30, 0 }
  0x24   : > { %s3954_s21 = scalar_select %p394_p5, %s3764_s22, %s396_s0  }
  0x26   : > { %4442 = sst [smem:[#allocation16_spill]] %s3954_s21 }
  0x28   : > { %667 = sbr.rel (!%p405_p4) target bundleno = 54 (0x36), region = 76  ;;  %s669_s26 = sand.u32 (%p405_p4), 1, %s3764_s22  }
  0x29   : > { %s3112_s20 = sshll.u32 (%p405_p4), %s3776_s2, 2  ;;  %s3111_s27 = sshll.u32 (%p405_p4), %s669_s26, 6 }
  0x2a   : > { %s3113_s16 = sshll.u32 (%p405_p4), %s3780_s25, 6  ;;  %s4443_s14 = sld [smem:[#allocation29_spill]] (%p405_p4) }
  0x2b   : > { %s674_s19 = sadd.s32 (%p405_p4), %s3113_s16, %s3112_s20  ;;  %s671_s29 = scalar_lea.vmem (%p405_p4), [#allocation6], %s3111_s27 }
  0x2c   : > { %s3114_s18 = sshll.u32 (%p405_p4), %s674_s19, 2 }
  0x30   : > { %s676_s4 = scalar_lea.vmem %s4443_s14, %s3114_s18 }
  0x31   : > { %v689_v0 = vld [vmem:[%s676_s4] sm:$0xff]  ;;  %v691_v1 = vld [vmem:[%s676_s4 + $0x8] sm:$0xff] }
  0x32   : > { %v693_v2 = vld [vmem:[%s676_s4 + $0x40] sm:$0xff]  ;;  %690 = vst [vmem:[%s671_s29] sm:$0xff] %v689_v0  ;;  %692 = vst [vmem:[%s671_s29 + $0x8] sm:$0xff] %v691_v1  ;;  %v695_v3 = vld [vmem:[%s676_s4 + $0x48] sm:$0xff] }
  0x33   : > { %694 = vst [vmem:[%s671_s29 + $0x10] sm:$0xff] %v693_v2  ;;  %v697_v4 = vld [vmem:[%s676_s4 + $0x80] sm:$0xff]  ;;  %v699_v5 = vld [vmem:[%s676_s4 + $0x88] sm:$0xff]  ;;  %696 = vst [vmem:[%s671_s29 + $0x18] sm:$0xff] %v695_v3 }
  0x34   : > { %698 = vst [vmem:[%s671_s29 + $0x20] sm:$0xff] %v697_v4  ;;  %700 = vst [vmem:[%s671_s29 + $0x28] sm:$0xff] %v699_v5  ;;  %v701_v6 = vld [vmem:[%s676_s4 + $0xc0] sm:$0xff]  ;;  %v703_v7 = vld [vmem:[%s676_s4 + $0xc8] sm:$0xff] }
  0x35   : > { %702 = vst [vmem:[%s671_s29 + $0x30] sm:$0xff] %v701_v6  ;;  %704 = vst [vmem:[%s671_s29 + $0x38] sm:$0xff] %v703_v7 }
  0x36 PF: > { %p3115_p7 = scmp.ge.s32.totalorder %s3784_s3, 1  ;;  %p752_p8 = scmp.lt.s32.totalorder %s3784_s3, 13 }
  0x38   : > { %p753_p9 = pnand %p3115_p7, %p752_p8 }
  0x3a   : > { %756 = sbr.rel (%p753_p9) target bundleno = 4399 (0x112f), region = 119 }
  0x41   : > { %s759_s16 = sand.u32 1, %s3760_s1   ;;  %p875_p10 = scmp.lt.s32.totalorder %s3772_s24, 2 }
  0x42   : > { %s3967_s17 = sshll.u32 %s759_s16, 6  ;;  %s3125_s18 = sshll.u32 %s3768_s23, 2 }
  0x43   : > { %p917_p11 = scmp.lt.s32.totalorder %s3125_s18, 15  ;;  %s4444_s0 = sld [smem:[#allocation22_spill]] }
  0x44   : > { %s3971_s19 = scalar_select %p875_p10, %s3772_s24, 2 }
  0x45   : > { %s4498_s18 = smov (!%p917_p11, %s3125_s18), 15  ;;  %s4445_s5 = sld [smem:[#allocation23_spill]] }
  0x46   : > { %s3222_s20 = sshll.u32 %s3971_s19, 5  ;;  %s4446_s6 = sld [smem:[#allocation24_spill]] }
  0x47   : > { %s4447_s10 = sld [smem:[#allocation25_spill]]  ;;  %s3126_s30 = sshll.u32 %s3971_s19, 4 }
  0x48   : > { %s3127_s22 = sshll.u32 %s3768_s23, 6  ;;  %s3128_s2 = sshll.u32 %s3971_s19, 8 }
  0x49   : > { %s3981_s4 = scalar_lea.vmem %s4444_s0, %s3222_s20  ;;  %s4019_s0 = sadd.s32 %s3126_s30, %s4498_s18 }
  0x4a   : > { %p926_p12 = scmp.lt.s32.totalorder %s3127_s22, 255  ;;  %s4454_s1 = sld [smem:[#allocation33_spill]] }
  0x4b   : > { %s3986_s14 = scalar_lea.vmem %s4445_s5, %s3222_s20  ;;  %s4455_s30 = sld [smem:[#allocation34_spill]] }
  0x4c   : > { %s3991_s21 = scalar_lea.vmem %s4446_s6, %s3222_s20  ;;  %s4453_s6 = sld [smem:[#allocation32_spill]] }
  0x4d   : > { %s4004_s29 = scalar_lea.vmem %s4447_s10, %s3222_s20  ;;  %s4500_s22 = smov (!%p926_p12, %s3127_s22), 255 }
  0x4e   : > { %4448 = sst [smem:[#allocation17_spill]] %s4004_s29  ;;  %s929_s11 = sadd.s32 %s3128_s2, %s4500_s22 }
  0x4f   : > { %p943_p13 = scmp.eq.s32.totalorder %s3772_s24, 0  ;;  %s3129_s29 = sshll.u32 %s929_s11, 2 }
  0x50   : > { %s938_s28 = scalar_lea.vmem %s4454_s1, %s3971_s19  ;;  %p944_p0 = scmp.eq.s32.totalorder %s3768_s23, 0 }
  0x51   : > { %s941_s12 = scalar_lea.vmem %s4455_s30, %s3971_s19  ;;  %s4456_s16 = sld [smem:[#allocation31_spill]] }
  0x52   : > { %s935_s26 = scalar_lea.vmem %s4453_s6, %s3971_s19  ;;  %p945_p1 = pnand %p944_p0, %p943_p13 }
  0x53   : > { %s4047_s25 = scalar_lea.vmem [#allocation6], %s3967_s17  ;;  %s4457_s6 = sld [smem:[#allocation19_spill]] (!%p945_p1)  ;;  %vm955_vm0 = vcmask (!%p945_p1), 130048   ;;  %vm1037_vm1 = vcmask (!%p945_p1), 261120  }
  0x54   : > { %948 = sbr.rel (%p945_p1) target bundleno = 312 (0x138), region = 127  ;;  %s4458_s2 = sld [smem:[#allocation18_spill]] (!%p945_p1) }
  0x55   : > { %s4460_s30 = sld [smem:[#allocation20_spill]] (!%p945_p1) }
  0x57   : > { %s4044_s15 = scalar_lea.vmem %s4456_s16, %s3129_s29 }
  0x59   : > { %v951_v8 = vld [vmem:[%s4457_s6] sm:$0xff] (!%p945_p1)  ;;  %v952_v9 = vld [vmem:[%s4457_s6 + $0x8] sm:$0xff] (!%p945_p1) }
  0x5a   : > { %s4459_s18 = smov (!%p945_p1), %s4458_s2  ;;  %v949_v10 = vld [vmem:[%s4458_s2] sm:$0xff] (!%p945_p1)  ;;  %v3437_v11 = vpack.c.bf16 (!%p945_p1), %v952_v9, %v951_v8 }
  0x5b   : > { %3334 = vmatprep.mubr.msk.f32.mxu0 %vm955_vm0, %v949_v10  ;;  %v950_v12 = vld [vmem:[%s4459_s18 + $0x8] sm:$0xff]  ;;  %v953_v14 = vld [vmem:[%s4460_s30] sm:$0xff] }
  0x5c   : > { %3438 = vmatprep.subr.bf16.mxu0 %v3437_v11  ;;  %v954_v13 = vld [vmem:[%s4460_s30 + $0x8] sm:$0xff] }
  0x5d   : > { %3440 = vmatpush3.bf16.msra.mxu0 %v3437_v11 }
  0x60   : > { %3335 = vmatmul.mubr.msk.f32.vlgmr.msra.gmra.mrb[0].mxu0 %vm955_vm0, %v950_v12 }
 0x133   : > { %v3336_v15 = vpop.f32.mrb[0].mxu0 }
 0x134   : > { %v1034_v16 = vadd.f32 %v3336_v15, %v954_v13  ;;  %v1028_v17 = vpop.f32.mrb[1].mxu0 }
 0x135   : > { %v1029_v18 = vadd.f32 %v1028_v17, %v953_v14 }
 0x136   : > { %1039 = vst.msk [vmem:[#allocation2 + $0x8] sm:$0xff] %vm1037_vm1, %v1034_v16 }
 0x137   : > { %1038 = vst.msk [vmem:[#allocation2] sm:$0xff] %vm1037_vm1, %v1029_v18 }
 0x138 PF: > { %p3132_p2 = scmp.ne.s32.totalorder %s3768_s23, 0 }
 0x139   : > { %v1138_v19 = vld [vmem:[%s3986_s14] sm:$0xff] (!%p3132_p2)  ;;  %v1139_v20 = vld [vmem:[%s3986_s14 + $0x8] sm:$0xff] (!%p3132_p2)  ;;  %v1140_v21 = vld [vmem:[%s3986_s14 + $0x10] sm:$0xff] (!%p3132_p2)  ;;  %vm1056_vm2 = vcmask (!%p3132_p2), 261120   ;;  %v3786_v25 = vmov (!%p3132_p2), 0.0   ;;  %s4461_s5 = scalar_lea.vmem (!%p3132_p2), %s4393_s8, %s3971_s19  ;;  %vm1312_vm3 = vcmask (!%p3132_p2), 64512   ;;  %s4462_s13 = scalar_lea.vmem (!%p3132_p2), %s4392_s7, %s3971_s19 }
 0x13a   : > { %1042 = sbr.rel (%p3132_p2) target bundleno = 3582 (0xdfe), region = 131  ;;  %v3449_v22 = vpack.c.bf16 (!%p3132_p2), %v1139_v20, %v1138_v19  ;;  %v1141_v23 = vld [vmem:[%s3986_s14 + $0x18] sm:$0xff] (!%p3132_p2)  ;;  %2284 = vst.msk [vmem:[#allocation4] sm:$0xff] (!%p3132_p2), %vm1056_vm2, %v3786_v25  ;;  %2285 = vst.msk [vmem:[#allocation4 + $0x8] sm:$0xff] (!%p3132_p2), %vm1056_vm2, %v3786_v25  ;;  %v1045_v26 = vld [vmem:[%s3981_s4] sm:$0xff] (!%p3132_p2)  ;;  %s4465_s2 = sld [smem:[#allocation21_spill]] (!%p3132_p2) }
 0x13b   : > { %v3453_v27 = vpack.c.bf16 (!%p3132_p2), %v1141_v23, %v1140_v21  ;;  %v1046_v28 = vld [vmem:[%s3981_s4 + $0x8] sm:$0xff] (!%p3132_p2)  ;;  %v1047_v29 = vld [vmem:[%s3981_s4 + $0x10] sm:$0xff] (!%p3132_p2)  ;;  %v1048_v31 = vld [vmem:[%s3981_s4 + $0x18] sm:$0xff] (!%p3132_p2)  ;;  %vm1400_vm5 = vcmask (!%p3132_p2), 130048   ;;  %s4467_s20 = scalar_lea.vmem (!%p3132_p2), %s4394_s9, %s3971_s19  ;;  %s3788_s14 = smov (!%p3132_p2), 112   ;;  %vm1716_vm6 = vcmask (!%p3132_p2), 130112  }
 0x13c   : > { %3450 = vmatprep.subr.bf16.mxu1 (!%p3132_p2), %v3449_v22  ;;  %v3441_v30 = vpack.c.bf16 (!%p3132_p2), %v1046_v28, %v1045_v26  ;;  %v3445_v32 = vpack.c.bf16 (!%p3132_p2), %v1048_v31, %v1047_v29  ;;  %v1224_v34 = vld [vmem:[%s3991_s21] sm:$0xff] (!%p3132_p2)  ;;  %v1225_v35 = vld [vmem:[%s3991_s21 + $0x8] sm:$0xff] (!%p3132_p2)  ;;  %v1226_v36 = vld [vmem:[%s3991_s21 + $0x10] sm:$0xff] (!%p3132_p2)  ;;  %s3789_s4 = smov (!%p3132_p2), 104   ;;  %s3791_s10 = smov (!%p3132_p2), 16   ;;  %vm1927_vm7 = vcmask (!%p3132_p2), 195712  }
 0x13d   : > { %3452 = vmatpush3.bf16.msra.mxu1 (!%p3132_p2), %v3449_v22  ;;  %v4084_v33 = vld [vmem:[#allocation2 + $0x8] sm:$0xff] (!%p3132_p2)  ;;  %v3457_v37 = vpack.c.bf16 (!%p3132_p2), %v1225_v35, %v1224_v34  ;;  %v1227_v38 = vld [vmem:[%s3991_s21 + $0x18] sm:$0xff] (!%p3132_p2)  ;;  %v3136_v40 = vld [vmem:[%s4461_s5] ss:$0 sm:$0xff] (!%p3132_p2)  ;;  %s3787_s21 = smov (!%p3132_p2), 120   ;;  %s3790_s5 = smov (!%p3132_p2), 8  }
 0x13e   : > { %v4072_v24 = vld [vmem:[#allocation2] sm:$0xff] (!%p3132_p2)  ;;  %3454 = vmatprep.subr.bf16.mxu1 (!%p3132_p2), %v3453_v27  ;;  %3442 = vmatprep.subr.bf16.mxu0 (!%p3132_p2), %v3441_v30  ;;  %v3461_v39 = vpack.c.bf16 (!%p3132_p2), %v1227_v38, %v1226_v36  ;;  %vm4108_vm4 = vmpackc.low (!%p3132_p2), %vm1312_vm3, %vm1312_vm3  ;;  %s4468_s27 = sld [smem:[#allocation17_spill]] (!%p3132_p2)  ;;  %vm2138_vm8 = vcmask (!%p3132_p2), 261312   ;;  %s4469_s11 = sld [smem:[#allocation26_spill]] (!%p3132_p2) }
 0x13f   : > { %3356 = vmatprep.mubr.msk.f32.mxu1 (!%p3132_p2), %vm1056_vm2, %v4072_v24  ;;  %3345 = vmatprep.mubr.msk.f32.mxu0 (!%p3132_p2), %vm1056_vm2, %v4072_v24  ;;  %v3133_v44 = vld [vmem:[%s4462_s13] ss:$0 sm:$0xff] (!%p3132_p2)  ;;  %s3792_s13 = smov (!%p3132_p2), 24   ;;  %s4471_s1 = sld [smem:[#allocation27_spill]] (!%p3132_p2) }
 0x140   : > { %3444 = vmatpush3.bf16.msra.mxu0 (!%p3132_p2), %v3441_v30  ;;  %s4466_s17 = smov (!%p3132_p2), %s4465_s2  ;;  %v4133_v53 = vld [vmem:[%s4465_s2] sm:$0xff] (!%p3132_p2) }
 0x141   : > { %3446 = vmatprep.subr.bf16.mxu0 %v3445_v32  ;;  %3456 = vmatpush3.bf16.msra.mxu1 %v3453_v27  ;;  %v4138_v55 = vld [vmem:[%s4466_s17 + $0x8] sm:$0xff]  ;;  %v3139_v62 = vld [vmem:[%s4467_s20] ss:$0 sm:$0xff] }
 0x144   : > { %3448 = vmatpush3.bf16.msra.mxu0 %v3445_v32  ;;  %3357 = vmatmul.mubr.msk.f32.vlgmr.msra.gmra.mrb[0].mxu1 %vm1056_vm2, %v4084_v33  ;;  %s4470_s2 = scalar_lea.vmem %s4469_s11, %s3971_s19 }
 0x145   : > { %3458 = vmatprep.subr.bf16.mxu0 %v3457_v37  ;;  %s4472_s3 = scalar_lea.vmem %s4471_s1, %s3971_s19 }
 0x147   : > { %3346 = vmatmul.mubr.msk.f32.vlgmr.msra.gmra.mrb[0].mxu0 %vm1056_vm2, %v4084_v33 }
 0x148   : > { %3367 = vmatprep.mubr.msk.f32.mxu0 %vm1056_vm2, %v4072_v24  ;;  %3460 = vmatpush3.bf16.msra.mxu0 %v3457_v37 }
 0x149   : > { %3462 = vmatprep.subr.bf16.mxu0 %v3461_v39 }
 0x14c   : > { %3464 = vmatpush3.bf16.msra.mxu0 %v3461_v39 }
 0x14f   : > { %3368 = vmatmul.mubr.msk.f32.vlgmr.msra.gmra.mrb[2].mxu0 %vm1056_vm2, %v4084_v33 }
 0x217   : > { %v3358_v41 = vpop.f32.mrb[0].mxu1 }
 0x218   : > { %v1221_v42 = vadd.f32 %v3358_v41, %v3136_v40  ;;  %v1215_v43 = vpop.f32.mrb[1].mxu1 }
 0x219   : > { %v1216_v45 = vadd.f32 %v3136_v40, %v1215_v43 }
 0x21a   : > { %v3347_v46 = vpop.f32.mrb[0].mxu0 }
 0x21b   : > { %v1129_v48 = vpop.f32.mrb[1].mxu0  ;;  %v3465_v49 = vpack.c.bf16 %v1221_v42, %v1216_v45  ;;  %v4116_v51 = vpack.i.bf16 %v1221_v42, %v1216_v45  ;;  %v4126_v52 = vadd.f32 %v3347_v46, %v3133_v44 }
 0x21c   : > { %v4114_v50 = vadd.f32 %v3133_v44, %v1129_v48 }
 0x21d   : > { %3467 = vmatprep.subr.msk.bf16.mxu1 %vm4108_vm4, %v3465_v49 }
 0x21e   : > { %1506 = vrot.lane.b32.xlu1 %v4114_v50, %s3787_s21  ;;  %3470 = vmatpush3.bf16.xpose.msk.msra.mxu1 %vm4108_vm4, %v3465_v49 }
 0x21f   : > { %3374 = vmatprep.mubr.msk.f32.mxu1 %vm1312_vm3, %v4114_v50 }
 0x222   : > { %v3369_v61 = vpop.f32.mrb[2].mxu0 }
 0x223   : > { %v1301_v63 = vpop.f32.mrb[3].mxu0  ;;  %v1307_v0 = vadd.f32 %v3369_v61, %v3139_v62 }
 0x224   : > { %v1302_v1 = vadd.f32 %v3139_v62, %v1301_v63 }
 0x225   : > { %3375 = vmatmul.mubr.msk.f32.vlgmr.msra.gmra.mrb[2].mxu1 %vm1312_vm3, %v4126_v52 }
 0x226   : > { %v3471_v2 = vpack.c.bf16 %v1307_v0, %v1302_v1  ;;  %v4169_v35 = vpack.i.bf16 %v1307_v0, %v1302_v1 }
 0x228   : > { %3472 = vmatprep.subr.bf16.mxu1 %v3471_v2 }
 0x229   : > { %3474 = vmatpush3.bf16.msra.mxu1 %v3471_v2 }
 0x290   : > { %v1507_v17 = vpop.permute.xlu1 %1506 }
 0x2f8   : > { %v3376_v54 = vpop.f32.mrb[2].mxu1 }
 0x2f9   : > { %v1391_v56 = vpop.f32.mrb[3].mxu1  ;;  %v1397_v58 = vadd.f32 %v3376_v54, %v4138_v55 }
 0x2fa   : > { %v1392_v57 = vadd.f32 %v1391_v56, %v4133_v53 }
 0x2fb   : > { %v1404_v60 = vsel %vm1400_vm5, %v1397_v58, -inf }
 0x2fc   : > { %v1401_v59 = vsel %vm1400_vm5, %v1392_v57, -inf }
 0x2fd   : > { %1402 = vmax.xlane.f32.xlu0 %v1401_v59 }
 0x301   : > { %1405 = vmax.xlane.f32.xlu0 %v1404_v60 }
 0x317   : > { %3587 = vrot.lane.b32.xlu0 %v4116_v51, %s3787_s21 }
 0x38a   : > { %v1403_v3 = vpop.xlane.xlu0 %1402 }
 0x38b   : > { %v1407_v4 = vsub.f32 %v1392_v57, %v1403_v3 }
 0x38d   : > { %v1409_v7 = vmul.f32 1.442695, %v1407_v4 }
 0x38e   : > { %v1406_v5 = vpop.xlane.xlu0 %1405 }
 0x38f   : > { %v1408_v6 = vsub.f32 %v1397_v58, %v1406_v5 }
 0x391   : > { %v1411_v8 = vmul.f32 1.442695, %v1408_v6 }
 0x392   : > { %v3588_v9 = vpop.permute.xlu0 %3587 }
 0x393   : > { %3616 = vpow2.f32 %v1411_v8  ;;  %v3590_v10 = vunpack.i.h.bf16 %v3588_v9  ;;  %v3589_v11 = vunpack.i.l.bf16 %v3588_v9 }
 0x394   : > { %3618 = vpow2.f32 %v1409_v7 }
 0x395   : > { %v3475_v12 = vpack.c.bf16 %v3590_v10, %v3589_v11 }
 0x397   : > { %3477 = vmatprep.subr.msk.bf16.mxu1 %vm4108_vm4, %v3475_v12 }
 0x39d   : > { %v3617_v13 = vpop.eup %3616 }
 0x39e   : > { %v1416_v14 = vsel %vm1400_vm5, %v3617_v13, 0.0  ;;  %v3619_v15 = vpop.eup %3618 }
 0x39f   : > { %1417 = vadd.xlane.f32.xlu1 %v1416_v14  ;;  %v1413_v16 = vsel %vm1400_vm5, %v3619_v15, 0.0 }
 0x3a3   : > { %1414 = vadd.xlane.f32.xlu1 %v1413_v16 }
 0x3b4   : > { %1508 = vrot.lane.b32.xlu1 %v4126_v52, %s3787_s21 }
 0x42c   : > { %v1418_v18 = vpop.xlane.xlu1 %1417 }
 0x42d   : > { %3620 = vrcp.f32 %v1418_v18 }
 0x430   : > { %v1415_v19 = vpop.xlane.xlu1 %1414 }
 0x431   : > { %3622 = vrcp.f32 %v1415_v19 }
 0x434   : > { %v1509_v25 = vpop.permute.xlu1 %1508 }
 0x437   : > { %v3621_v20 = vpop.eup %3620 }
 0x438   : > { %v1422_v23 = vmul.f32 %v3621_v20, %v3617_v13 }
 0x43b   : > { %v3623_v21 = vpop.eup %3622 }
 0x43c   : > { %v1421_v22 = vmul.f32 %v3623_v21, %v3619_v15 }
 0x43e   : > { %3381 = vmatprep.mubr.msk.f32.mxu1 %vm1400_vm5, %v1421_v22 }
 0x43f   : > { %3382 = vmatmul.mubr.msk.f32.vlgmr.msra.gmra.mrb[4].mxu1 %vm1400_vm5, %v1422_v23 }
 0x440   : > { %3480 = vmatpush3.bf16.xpose.msk.msra.mxu1 %vm4108_vm4, %v3475_v12  ;;  %3388 = vmatprep.mubr.msk.f32.mxu1 %vm1312_vm3, %v1507_v17 }
 0x447   : > { %3389 = vmatmul.mubr.msk.f32.vlgmr.msra.gmra.mrb[6].mxu1 %vm1312_vm3, %v1509_v25 }
 0x512   : > { %v3383_v26 = vpop.f32.mrb[4].mxu1 }
 0x513   : > { %1505 = vst.msk [vmem:[#allocation5 + $0x8] sm:$0xff] %vm1312_vm3, %v3383_v26  ;;  %v1495_v27 = vpop.f32.mrb[5].mxu1 }
 0x514   : > { %1504 = vst.msk [vmem:[#allocation5] sm:$0xff] %vm1312_vm3, %v1495_v27 }
 0x51a   : > { %v3390_v28 = vpop.f32.mrb[6].mxu1 }
 0x51b   : > { %v1594_v29 = vadd.f32 %v3390_v28, %v4138_v55  ;;  %v1588_v30 = vpop.f32.mrb[7].mxu1 }
 0x51c   : > { %v1589_v31 = vadd.f32 %v1588_v30, %v4133_v53 }
 0x51d   : > { %v1600_v32 = vsel %vm1400_vm5, %v1594_v29, -inf }
 0x51e   : > { %1601 = vmax.xlane.f32.xlu0 %v1600_v32  ;;  %v1597_v34 = vsel %vm1400_vm5, %v1589_v31, -inf }
 0x51f   : > { %1598 = vmax.xlane.f32.xlu1 %v1597_v34 }
 0x530   : > { %3592 = vrot.lane.b32.xlu1 %v4169_v35, %s3787_s21 }
 0x534   : > { %1719 = vrot.lane.b32.xlu1 %v4114_v50, %s3788_s14 }
 0x538   : > { %1721 = vrot.lane.b32.xlu1 %v4126_v52, %s3788_s14 }
 0x5ab   : > { %v1602_v36 = vpop.xlane.xlu0 %1601 }
 0x5ac   : > { %v1604_v37 = vsub.f32 %v1594_v29, %v1602_v36  ;;  %v1599_v38 = vpop.xlane.xlu1 %1598 }
 0x5ad   : > { %v1603_v39 = vsub.f32 %v1589_v31, %v1599_v38 }
 0x5ae   : > { %v1607_v40 = vmul.f32 1.442695, %v1604_v37 }
 0x5af   : > { %v1605_v41 = vmul.f32 1.442695, %v1603_v39 }
 0x5b0   : > { %3624 = vpow2.f32 %v1607_v40  ;;  %v3593_v42 = vpop.permute.xlu1 %3592 }
 0x5b1   : > { %v3595_v43 = vunpack.i.h.bf16 %v3593_v42  ;;  %v3594_v44 = vunpack.i.l.bf16 %v3593_v42  ;;  %3626 = vpow2.f32 %v1605_v41 }
 0x5b3   : > { %v3481_v45 = vpack.c.bf16 %v3595_v43, %v3594_v44 }
 0x5b4   : > { %v1720_v2 = vpop.permute.xlu1 %1719 }
 0x5b5   : > { %3482 = vmatprep.subr.bf16.mxu0 %v3481_v45 }
 0x5b6   : > { %3484 = vmatpush3.bf16.msra.mxu0 %v3481_v45 }
 0x5b8   : > { %v1722_v3 = vpop.permute.xlu1 %1721 }
 0x5ba   : > { %v3625_v46 = vpop.eup %3624 }
 0x5bb   : > { %v1612_v48 = vsel %vm1400_vm5, %v3625_v46, 0.0  ;;  %v3627_v49 = vpop.eup %3626 }
 0x5bc   : > { %1613 = vadd.xlane.f32.xlu0 %v1612_v48  ;;  %v1609_v54 = vsel %vm1400_vm5, %v3627_v49, 0.0 }
 0x5c0   : > { %1610 = vadd.xlane.f32.xlu0 %v1609_v54 }
 0x5d6   : > { %3597 = vrot.lane.b32.xlu0 %v4116_v51, %s3788_s14 }
 0x649   : > { %v1614_v56 = vpop.xlane.xlu0 %1613 }
 0x64a   : > { %3628 = vrcp.f32 %v1614_v56 }
 0x64d   : > { %v1611_v57 = vpop.xlane.xlu0 %1610 }
 0x64e   : > { %3630 = vrcp.f32 %v1611_v57 }
 0x651   : > { %v3598_v58 = vpop.permute.xlu0 %3597 }
 0x652   : > { %v3600_v59 = vunpack.i.h.bf16 %v3598_v58  ;;  %v3599_v60 = vunpack.i.l.bf16 %v3598_v58 }
 0x654   : > { %v3485_v61 = vpack.c.bf16 %v3600_v59, %v3599_v60  ;;  %v3629_v62 = vpop.eup %3628 }
 0x655   : > { %v1618_v1 = vmul.f32 %v3629_v62, %v3625_v46 }
 0x656   : > { %3487 = vmatprep.subr.msk.bf16.mxu0 %vm4108_vm4, %v3485_v61 }
 0x658   : > { %v3631_v63 = vpop.eup %3630 }
 0x659   : > { %v1617_v0 = vmul.f32 %v3631_v63, %v3627_v49 }
 0x65b   : > { %3395 = vmatprep.mubr.msk.f32.mxu0 %vm1400_vm5, %v1617_v0 }
 0x65c   : > { %3396 = vmatmul.mubr.msk.f32.vlgmr.msra.gmra.mrb[4].mxu0 %vm1400_vm5, %v1618_v1 }
 0x65d   : > { %3490 = vmatpush3.bf16.xpose.msk.msra.mxu0 %vm4108_vm4, %v3485_v61  ;;  %3402 = vmatprep.mubr.msk.f32.mxu0 %vm1312_vm3, %v1720_v2 }
 0x664   : > { %3403 = vmatmul.mubr.msk.f32.vlgmr.msra.gmra.mrb[6].mxu0 %vm1312_vm3, %v1722_v3 }
 0x72f   : > { %v4189_v4 = vpop.f32.mrb[4].mxu0 }
 0x730   : > { %v4191_v5 = vpop.f32.mrb[5].mxu0 }
 0x737   : > { %v3404_v6 = vpop.f32.mrb[6].mxu0 }
 0x738   : > { %v1807_v7 = vadd.f32 %v3404_v6, %v4138_v55  ;;  %v1801_v8 = vpop.f32.mrb[7].mxu0 }
 0x739   : > { %v1802_v9 = vadd.f32 %v1801_v8, %v4133_v53 }
 0x73a   : > { %v1813_v10 = vsel %vm1400_vm5, %v1807_v7, -inf }
 0x73b   : > { %1814 = vmax.xlane.f32.xlu0 %v1813_v10  ;;  %v1810_v11 = vsel %vm1400_vm5, %v1802_v9, -inf }
 0x73c   : > { %1811 = vmax.xlane.f32.xlu1 %v1810_v11  ;;  %v2145_v11 = vld [vmem:[%s4468_s27 + $0x10] sm:$0xff] }
 0x74d   : > { %3602 = vrot.lane.b32.xlu1 %v4169_v35, %s3788_s14 }
 0x751   : > { %1930 = vrot.lane.b32.xlu1 %v4114_v50, %s3789_s4 }
 0x755   : > { %1932 = vrot.lane.b32.xlu1 %v4126_v52, %s3789_s4 }
 0x7c8   : > { %v1815_v12 = vpop.xlane.xlu0 %1814 }
 0x7c9   : > { %v1817_v13 = vsub.f32 %v1807_v7, %v1815_v12  ;;  %v1812_v14 = vpop.xlane.xlu1 %1811  ;;  %v2146_v12 = vld [vmem:[%s4468_s27 + $0x18] sm:$0xff] }
 0x7ca   : > { %v1816_v15 = vsub.f32 %v1802_v9, %v1812_v14  ;;  %v2144_v9 = vld [vmem:[%s4468_s27 + $0x8] sm:$0xff] }
 0x7cb   : > { %v1820_v16 = vmul.f32 1.442695, %v1817_v13  ;;  %v3509_v13 = vpack.c.bf16 %v2146_v12, %v2145_v11 }
 0x7cc   : > { %v1818_v17 = vmul.f32 1.442695, %v1816_v15 }
 0x7cd   : > { %3632 = vpow2.f32 %v1820_v16  ;;  %v3603_v18 = vpop.permute.xlu1 %3602 }
 0x7ce   : > { %v3605_v19 = vunpack.i.h.bf16 %v3603_v18  ;;  %v3604_v20 = vunpack.i.l.bf16 %v3603_v18  ;;  %3634 = vpow2.f32 %v1818_v17 }
 0x7d0   : > { %v3491_v21 = vpack.c.bf16 %v3605_v19, %v3604_v20  ;;  %v3166_v20 = vld [vmem:[%s4470_s2] ss:$0 sm:$0xff] }
 0x7d1   : > { %v1931_v37 = vpop.permute.xlu1 %1930 }
 0x7d2   : > { %3492 = vmatprep.subr.bf16.mxu1 %v3491_v21 }
 0x7d3   : > { %3494 = vmatpush3.bf16.msra.mxu1 %v3491_v21 }
 0x7d7   : > { %v3633_v22 = vpop.eup %3632 }
 0x7d8   : > { %v1825_v50 = vsel %vm1400_vm5, %v3633_v22, 0.0  ;;  %v3635_v23 = vpop.eup %3634 }
 0x7d9   : > { %1826 = vadd.xlane.f32.xlu0 %v1825_v50  ;;  %v1822_v52 = vsel %vm1400_vm5, %v3635_v23, 0.0 }
 0x7dd   : > { %1823 = vadd.xlane.f32.xlu0 %v1822_v52 }
 0x7f3   : > { %3607 = vrot.lane.b32.xlu0 %v4116_v51, %s3789_s4  ;;  %v1933_v51 = vpop.permute.xlu1 %1932 }
 0x866   : > { %v1827_v25 = vpop.xlane.xlu0 %1826 }
 0x867   : > { %3636 = vrcp.f32 %v1827_v25 }
 0x86a   : > { %v1824_v26 = vpop.xlane.xlu0 %1823 }
 0x86b   : > { %3638 = vrcp.f32 %v1824_v26 }
 0x86e   : > { %v3608_v27 = vpop.permute.xlu0 %3607 }
 0x86f   : > { %v3610_v28 = vunpack.i.h.bf16 %v3608_v27  ;;  %v3609_v29 = vunpack.i.l.bf16 %v3608_v27 }
 0x871   : > { %v3495_v30 = vpack.c.bf16 %v3610_v28, %v3609_v29  ;;  %v3637_v31 = vpop.eup %3636 }
 0x872   : > { %v1831_v36 = vmul.f32 %v3637_v31, %v3633_v22 }
 0x873   : > { %3497 = vmatprep.subr.msk.bf16.mxu1 %vm4108_vm4, %v3495_v30 }
 0x875   : > { %v3639_v32 = vpop.eup %3638 }
 0x876   : > { %v1830_v34 = vmul.f32 %v3639_v32, %v3635_v23 }
 0x878   : > { %3409 = vmatprep.mubr.msk.f32.mxu1 %vm1400_vm5, %v1830_v34 }
 0x879   : > { %3410 = vmatmul.mubr.msk.f32.vlgmr.msra.gmra.mrb[8].mxu1 %vm1400_vm5, %v1831_v36 }
 0x87a   : > { %3500 = vmatpush3.bf16.xpose.msk.msra.mxu1 %vm4108_vm4, %v3495_v30  ;;  %3416 = vmatprep.mubr.msk.f32.mxu1 %vm1312_vm3, %v1931_v37 }
 0x881   : > { %3417 = vmatmul.mubr.msk.f32.vlgmr.msra.gmra.mrb[10].mxu1 %vm1312_vm3, %v1933_v51 }
 0x94c   : > { %v3411_v38 = vpop.f32.mrb[8].mxu1 }
 0x94d   : > { %v1910_v39 = vpop.f32.mrb[9].mxu1 }
 0x954   : > { %v3418_v40 = vpop.f32.mrb[10].mxu1 }
 0x955   : > { %v2018_v41 = vadd.f32 %v3418_v40, %v4138_v55  ;;  %v2012_v42 = vpop.f32.mrb[11].mxu1 }
 0x956   : > { %v2013_v43 = vadd.f32 %v2012_v42, %v4133_v53 }
 0x957   : > { %v2024_v44 = vsel %vm1400_vm5, %v2018_v41, -inf }
 0x958   : > { %2025 = vmax.xlane.f32.xlu0 %v2024_v44  ;;  %v2021_v45 = vsel %vm1400_vm5, %v2013_v43, -inf  ;;  %v3169_v44 = vld [vmem:[%s4472_s3] ss:$0 sm:$0xff] }
 0x959   : > { %2022 = vmax.xlane.f32.xlu1 %v2021_v45 }
 0x96a   : > { %3612 = vrot.lane.b32.xlu1 %v4169_v35, %s3789_s4  ;;  %s4473_s4 = sld [smem:[#allocation28_spill]] }
 0x96e   : > { %1712 = vrot.lane.b32.xlu1 %v4189_v4, %s3790_s5 }
 0x972   : > { %1921 = vrot.lane.b32.xlu1 %v1910_v39, %s3791_s10 }
 0x976   : > { %1923 = vrot.lane.b32.xlu1 %v3411_v38, %s3791_s10 }
 0x9e5   : > { %v2026_v47 = vpop.xlane.xlu0 %2025 }
 0x9e6   : > { %v2028_v55 = vsub.f32 %v2018_v41, %v2026_v47  ;;  %v2023_v46 = vpop.xlane.xlu1 %2022 }
 0x9e7   : > { %v2027_v53 = vsub.f32 %v2013_v43, %v2023_v46 }
 0x9e8   : > { %v2031_v48 = vmul.f32 1.442695, %v2028_v55 }
 0x9e9   : > { %v2029_v49 = vmul.f32 1.442695, %v2027_v53 }
 0x9ea   : > { %v3613_v54 = vpop.permute.xlu1 %3612 }
 0x9eb   : > { %3640 = vpow2.f32 %v2029_v49  ;;  %v3615_v56 = vunpack.i.h.bf16 %v3613_v54  ;;  %v3614_v57 = vunpack.i.l.bf16 %v3613_v54 }
 0x9ec   : > { %3642 = vpow2.f32 %v2031_v48 }
 0x9ed   : > { %v3501_v35 = vpack.c.bf16 %v3615_v56, %v3614_v57 }
 0x9ee   : > { %v1713_v58 = vpop.permute.xlu1 %1712 }
 0x9ef   : > { %1718 = vst.msk [vmem:[#allocation5 + $0x8] sm:$0xff] %vm1716_vm6, %v1713_v58  ;;  %3502 = vmatprep.subr.bf16.mxu0 %v3501_v35 }
 0x9f0   : > { %3504 = vmatpush3.bf16.msra.mxu0 %v3501_v35 }
 0x9f2   : > { %v1922_v59 = vpop.permute.xlu1 %1921 }
 0x9f5   : > { %v3641_v60 = vpop.eup %3640 }
 0x9f6   : > { %v1924_v61 = vpop.permute.xlu1 %1923  ;;  %v2033_v62 = vsel %vm1400_vm5, %v3641_v60, 0.0  ;;  %v3643_v63 = vpop.eup %3642 }
 0x9f7   : > { %1929 = vst.msk [vmem:[#allocation5 + $0x8] sm:$0xff] %vm1927_vm7, %v1924_v61  ;;  %2034 = vadd.xlane.f32.xlu0 %v2033_v62  ;;  %v2036_v0 = vsel %vm1400_vm5, %v3643_v63, 0.0 }
 0x9fb   : > { %2037 = vadd.xlane.f32.xlu0 %v2036_v0 }
 0xa11   : > { %1710 = vrot.lane.b32.xlu0 %v4191_v5, %s3790_s5  ;;  %v2143_v5 = vld [vmem:[%s4468_s27] sm:$0xff]  ;;  %s4474_s5 = scalar_lea.vmem %s4473_s4, %s3971_s19 }
 0xa12   : > { %v3505_v10 = vpack.c.bf16 %v2144_v9, %v2143_v5  ;;  %v3170_v47 = vld [vmem:[%s4474_s5] ss:$0 sm:$0xff] }
 0xa14   : > { %3506 = vmatprep.subr.bf16.mxu0 %v3505_v10 }
 0xa84   : > { %v2035_v1 = vpop.xlane.xlu0 %2034 }
 0xa85   : > { %3644 = vrcp.f32 %v2035_v1 }
 0xa88   : > { %v2038_v2 = vpop.xlane.xlu0 %2037 }
 0xa89   : > { %3646 = vrcp.f32 %v2038_v2 }
 0xa8c   : > { %v1711_v3 = vpop.permute.xlu0 %1710 }
 0xa8d   : > { %1717 = vst.msk [vmem:[#allocation5] sm:$0xff] %vm1716_vm6, %v1711_v3 }
 0xa8e   : > { %1928 = vst.msk [vmem:[#allocation5] sm:$0xff] %vm1927_vm7, %v1922_v59 }
 0xa8f   : > { %v3645_v4 = vpop.eup %3644 }
 0xa90   : > { %v2041_v6 = vmul.f32 %v3645_v4, %v3641_v60 }
 0xa92   : > { %3423 = vmatprep.mubr.msk.f32.mxu0 %vm1400_vm5, %v2041_v6 }
 0xa93   : > { %v3647_v7 = vpop.eup %3646 }
 0xa94   : > { %v2042_v8 = vmul.f32 %v3647_v7, %v3643_v63 }
 0xa96   : > { %3424 = vmatmul.mubr.msk.f32.vlgmr.msra.gmra.mrb[8].mxu0 %vm1400_vm5, %v2042_v8 }
 0xa97   : > { %3508 = vmatpush3.bf16.msra.mxu0 %v3505_v10 }
 0xa98   : > { %3510 = vmatprep.subr.bf16.mxu0 %v3509_v13 }
 0xa9b   : > { %3512 = vmatpush3.bf16.msra.mxu0 %v3509_v13 }
 0xb69   : > { %v3425_v14 = vpop.f32.mrb[8].mxu0 }
 0xb6a   : > { %2134 = vrot.lane.b32.xlu1 %v3425_v14, %s3792_s13  ;;  %v2121_v15 = vpop.f32.mrb[9].mxu0 }
 0xb6b   : > { %2132 = vrot.lane.b32.xlu0 %v2121_v15, %s3792_s13 }
 0xbdc   : > { %v2135_v16 = vpop.permute.xlu1 %2134 }
 0xbdd   : > { %2140 = vst.msk [vmem:[#allocation5 + $0x8] sm:$0xff] %vm2138_vm8, %v2135_v16  ;;  %v2133_v17 = vpop.permute.xlu0 %2132 }
 0xbde   : > { %2139 = vst.msk [vmem:[#allocation5] sm:$0xff] %vm2138_vm8, %v2133_v17 }
 0xbe4   : > { %v2142_v19 = vld [vmem:[#allocation5 + $0x8] sm:$0xff] }
 0xbe5   : > { %v2141_v18 = vld [vmem:[#allocation5] sm:$0xff] }
 0xbe6   : > { %3434 = vmatprep.mubr.msk.f32.mxu0 %vm1056_vm2, %v2141_v18 }
 0xbe7   : > { %3435 = vmatmul.mubr.msk.f32.vlgmr.msra.gmra.mrb[10].mxu0 %vm1056_vm2, %v2142_v19 }
 0xcba   : > { %v3436_v21 = vpop.f32.mrb[10].mxu0 }
 0xcbb   : > { %v2232_v22 = vadd.f32 %v3436_v21, %v3166_v20  ;;  %v2226_v50 = vpop.f32.mrb[11].mxu0 }
 0xcbc   : > { %v2227_v23 = vadd.f32 %v3166_v20, %v2226_v50 }
 0xcbd   : > { %v2236_v52 = vadd.f32 %v2232_v22, %v4084_v33 }
 0xcbe   : > { %v2235_v25 = vadd.f32 %v2227_v23, %v4072_v24 }
 0xcbf   : > { %v2242_v26 = vsel %vm1056_vm2, %v2236_v52, 0.0 }
 0xcc0   : > { %2243 = vadd.xlane.f32.xlu1 %v2242_v26  ;;  %v2239_v27 = vsel %vm1056_vm2, %v2235_v25, 0.0 }
 0xcc1   : > { %2240 = vadd.xlane.f32.xlu0 %v2239_v27 }
 0xd4d   : > { %v2244_v28 = vpop.xlane.xlu1 %2243 }
 0xd4e   : > { %v2247_v29 = vmul.f32 0.03125, %v2244_v28  ;;  %v2241_v30 = vpop.xlane.xlu0 %2240 }
 0xd4f   : > { %v2246_v31 = vmul.f32 0.03125, %v2241_v30 }
 0xd50   : > { %v2249_v32 = vsub.f32 %v2236_v52, %v2247_v29 }
 0xd51   : > { %v2248_v34 = vsub.f32 %v2235_v25, %v2246_v31 }
 0xd52   : > { %v2251_v33 = vmul.f32 %v2249_v32, %v2249_v32 }
 0xd53   : > { %v2250_v36 = vmul.f32 %v2248_v34, %v2248_v34 }
 0xd54   : > { %v2255_v24 = vsel %vm1056_vm2, %v2251_v33, 0.0 }
 0xd55   : > { %v2252_v37 = vsel %vm1056_vm2, %v2250_v36, 0.0 }
 0xd56   : > { %2253 = vadd.xlane.f32.xlu0 %v2252_v37 }
 0xd5a   : > { %2256 = vadd.xlane.f32.xlu0 %v2255_v24 }
 0xde3   : > { %v2254_v51 = vpop.xlane.xlu0 %2253 }
 0xde4   : > { %v2258_v38 = vmul.f32 0.03125, %v2254_v51 }
 0xde6   : > { %v2260_v39 = vadd.f32 1e-05, %v2258_v38 }
 0xde7   : > { %v2257_v40 = vpop.xlane.xlu0 %2256 }
 0xde8   : > { %3648 = vrsqrt.f32 %v2260_v39  ;;  %v2259_v41 = vmul.f32 0.03125, %v2257_v40 }
 0xdea   : > { %v2261_v42 = vadd.f32 1e-05, %v2259_v41 }
 0xdec   : > { %3650 = vrsqrt.f32 %v2261_v42 }
 0xdf2   : > { %v3649_v43 = vpop.eup %3648 }
 0xdf3   : > { %v2264_v45 = vmul.f32 %v3649_v43, %v2248_v34 }
 0xdf5   : > { %v2272_v55 = vmul.f32 %v3169_v44, %v2264_v45 }
 0xdf6   : > { %v3651_v46 = vpop.eup %3650 }
 0xdf7   : > { %v2280_v53 = vadd.f32 %v3170_v47, %v2272_v55  ;;  %v2265_v48 = vmul.f32 %v3651_v46, %v2249_v32 }
 0xdf9   : > { %2282 = vst.msk [vmem:[#allocation3] sm:$0xff] %vm1056_vm2, %v2280_v53  ;;  %v2273_v49 = vmul.f32 %v3169_v44, %v2265_v48 }
 0xdfb   : > { %v2281_v54 = vadd.f32 %v3170_v47, %v2273_v49 }
 0xdfd   : > { %2283 = vst.msk [vmem:[#allocation3 + $0x8] sm:$0xff] %vm1056_vm2, %v2281_v54 }
 0xdfe PF: > { %v3652_v56 = vld [vmem:[%s4047_s25 + $0x4] ss:$16 sps:$4 sm:$0xff]   ;;  %v3654_v57 = vld [vmem:[%s4047_s25 + $0xc] ss:$16 sps:$4 sm:$0xff]   ;;  %v3793_v35 = vmov 0   ;;  %vm2359_vm9 = vcmask 261120   ;;  %v2299_v36 = vlaneseq }
 0xdff   : > { %2395 = vmatprep.mubr.bf16.mxu0 %v3793_v35  ;;  %2438 = vmatprep.mubr.bf16.mxu1 %v3793_v35  ;;  %v3656_v58 = vld [vmem:[%s4047_s25] ss:$16 sps:$4 sm:$0xff]   ;;  %v3657_v59 = vld [vmem:[%s4047_s25 + $0x8] ss:$16 sps:$4 sm:$0xff]   ;;  %v3658_v60 = vld [vmem:[%s4047_s25 + $0x24] ss:$16 sps:$4 sm:$0xff]  }
 0xe00   : > { %2363 = vmatprep.subr.bf16.mxu0 %v3652_v56  ;;  %2406 = vmatprep.subr.bf16.mxu1 %v3654_v57  ;;  %v3660_v61 = vld [vmem:[%s4047_s25 + $0x2c] ss:$16 sps:$4 sm:$0xff]   ;;  %v3662_v62 = vld [vmem:[%s4047_s25 + $0x20] ss:$16 sps:$4 sm:$0xff]   ;;  %v3663_v63 = vld [vmem:[%s4047_s25 + $0x28] ss:$16 sps:$4 sm:$0xff]  }
 0xe01   : > { %2364 = vmatpush1.bf16.msra.mxu0 %v3656_v58  ;;  %2407 = vmatpush1.bf16.msra.mxu1 %v3657_v59  ;;  %v2286_v0 = vld [vmem:[#allocation3] sm:$0xff]  ;;  %v3664_v2 = vld [vmem:[%s4044_s15 + $0x40] sm:$0xff]   ;;  %v3668_v8 = vld [vmem:[%s4044_s15 + $0x48] sm:$0xff]   ;;  %v2300_v37 = vshrl.u32 %v2299_v36, 7  ;;  %s4475_s27 = sld [smem:[#allocation30_spill]]  ;;  %p3213_p3 = scmp.ne.s32.totalorder %s3768_s23, 3 }
 0xe02   : > { %2365 = vmatprep.subr.bf16.mxu0 %v3658_v60  ;;  %2408 = vmatprep.subr.bf16.mxu1 %v3660_v61  ;;  %v3665_v4 = vld [vmem:[%s4044_s15 + $0xc0] sm:$0xff]   ;;  %v3669_v5 = vld [vmem:[%s4044_s15 + $0xc8] sm:$0xff]   ;;  %v3672_v11 = vld [vmem:[%s4044_s15 + $0x50] sm:$0xff]   ;;  %p3217_p4 = scmp.ne.s32.totalorder (!%p3213_p3), %s3772_s24, 2 }
 0xe03   : > { %v3666_v6 = vld [vmem:[%s4044_s15] sm:$0xff]   ;;  %v3670_v9 = vld [vmem:[%s4044_s15 + $0x8] sm:$0xff]   ;;  %v3673_v12 = vld [vmem:[%s4044_s15 + $0xd0] sm:$0xff]   ;;  %v2301_v33 = vsub.s32 0, %v2300_v37  ;;  %v2309_v24 = vsub.s32 2, %v2300_v37  ;;  %v2305_v38 = vsub.s32 1, %v2300_v37 }
 0xe04   : > { %v2287_v1 = vld [vmem:[#allocation3 + $0x8] sm:$0xff]  ;;  %v3667_v7 = vld [vmem:[%s4044_s15 + $0x80] sm:$0xff]   ;;  %v3671_v10 = vld [vmem:[%s4044_s15 + $0x88] sm:$0xff]   ;;  %v2313_v39 = vsub.s32 3, %v2300_v37 }
 0xe05   : > { %v2288_v3 = vpack.c.bf16 %v2287_v1, %v2286_v0  ;;  %2366 = vmatpush1.bf16.msra.mxu0 %v3662_v62  ;;  %2409 = vmatpush1.bf16.msra.mxu1 %v3663_v63  ;;  %v3674_v13 = vld [vmem:[%s4044_s15 + $0x10] sm:$0xff]   ;;  %v3676_v15 = vld [vmem:[%s4044_s15 + $0x58] sm:$0xff]   ;;  %v3680_v19 = vld [vmem:[%s4044_s15 + $0x60] sm:$0xff]  }
 0xe06   : > { %3286 = vmatprep.subr.bf16.mxu0 %v3664_v2  ;;  %3308 = vmatprep.subr.bf16.mxu1 %v3665_v4  ;;  %v3675_v14 = vld [vmem:[%s4044_s15 + $0x90] sm:$0xff]   ;;  %v3677_v16 = vld [vmem:[%s4044_s15 + $0xd8] sm:$0xff]   ;;  %v3681_v20 = vld [vmem:[%s4044_s15 + $0xe0] sm:$0xff]  }
 0xe07   : > { %v3678_v17 = vld [vmem:[%s4044_s15 + $0x18] sm:$0xff]   ;;  %v3682_v21 = vld [vmem:[%s4044_s15 + $0x20] sm:$0xff]   ;;  %v3684_v50 = vld [vmem:[%s4044_s15 + $0x68] sm:$0xff]   ;;  %s4476_s13 = scalar_lea.vmem %s4475_s27, %s4019_s0 }
 0xe08   : > { %3179 = vmatmul.mubr.msk.bf16.vlgmr.msra.gmra.mrb[0].mxu0 %vm2359_vm9, %v2288_v3  ;;  %3180 = vmatmul.mubr.msk.bf16.vlgmr.msra.gmra.mrb[0].mxu1 %vm2359_vm9, %v2288_v3  ;;  %v3679_v18 = vld [vmem:[%s4044_s15 + $0x98] sm:$0xff]   ;;  %v3683_v22 = vld [vmem:[%s4044_s15 + $0xa0] sm:$0xff]   ;;  %v3685_v23 = vld [vmem:[%s4044_s15 + $0xe8] sm:$0xff]  }
 0xe09   : > { %3287 = vmatpush3.bf16.msra.mxu0 %v3666_v6  ;;  %3309 = vmatpush3.bf16.msra.mxu1 %v3667_v7  ;;  %v3686_v52 = vld [vmem:[%s4044_s15 + $0x28] sm:$0xff]   ;;  %v3688_v26 = vld [vmem:[%s4044_s15 + $0x70] sm:$0xff]   ;;  %v3692_v30 = vld [vmem:[%s4044_s15 + $0x78] sm:$0xff]  }
 0xe0a   : > { %3288 = vmatprep.subr.bf16.mxu0 %v3668_v8  ;;  %3310 = vmatprep.subr.bf16.mxu1 %v3669_v5  ;;  %v3687_v25 = vld [vmem:[%s4044_s15 + $0xa8] sm:$0xff]   ;;  %v3689_v27 = vld [vmem:[%s4044_s15 + $0xf0] sm:$0xff]   ;;  %v3693_v31 = vld [vmem:[%s4044_s15 + $0xf8] sm:$0xff]  }
 0xe0b   : > { %v3690_v28 = vld [vmem:[%s4044_s15 + $0x30] sm:$0xff]   ;;  %v3694_v32 = vld [vmem:[%s4044_s15 + $0x38] sm:$0xff]   ;;  %v2297_v51 = vld [vmem:[%s4476_s13] sm:$0xf] }
 0xe0c   : > { %v3691_v29 = vld [vmem:[%s4044_s15 + $0xb0] sm:$0xff]   ;;  %v3695_v34 = vld [vmem:[%s4044_s15 + $0xb8] sm:$0xff]   ;;  %v2302_v40 = vrot.slane %v2297_v51, %v2301_v33  ;;  %v2310_v41 = vrot.slane %v2297_v51, %v2309_v24  ;;  %v2306_v42 = vrot.slane %v2297_v51, %v2305_v38  ;;  %v2314_v43 = vrot.slane %v2297_v51, %v2313_v39 }
 0xe0d   : > { %3289 = vmatpush3.bf16.msra.mxu0 %v3670_v9  ;;  %3311 = vmatpush3.bf16.msra.mxu1 %v3671_v10 }
 0xe0e   : > { %3290 = vmatprep.subr.bf16.mxu0 %v3672_v11  ;;  %3312 = vmatprep.subr.bf16.mxu1 %v3673_v12 }
 0xe11   : > { %3291 = vmatpush3.bf16.msra.mxu0 %v3674_v13  ;;  %3313 = vmatpush3.bf16.msra.mxu1 %v3675_v14 }
 0xe12   : > { %3292 = vmatprep.subr.bf16.mxu0 %v3676_v15  ;;  %3314 = vmatprep.subr.bf16.mxu1 %v3677_v16 }
 0xe15   : > { %3293 = vmatpush3.bf16.msra.mxu0 %v3678_v17  ;;  %3315 = vmatpush3.bf16.msra.mxu1 %v3679_v18  ;;  %v2457_v18 = vld [vmem:[#allocation4] sm:$0xff] }
 0xe16   : > { %3294 = vmatprep.subr.bf16.mxu0 %v3680_v19  ;;  %3316 = vmatprep.subr.bf16.mxu1 %v3681_v20 }
 0xe19   : > { %3295 = vmatpush3.bf16.msra.mxu0 %v3682_v21  ;;  %3317 = vmatpush3.bf16.msra.mxu1 %v3683_v22 }
 0xe1a   : > { %3296 = vmatprep.subr.bf16.mxu0 %v3684_v50  ;;  %3318 = vmatprep.subr.bf16.mxu1 %v3685_v23  ;;  %v2458_v23 = vld [vmem:[#allocation4 + $0x8] sm:$0xff] }
 0xe1d   : > { %3297 = vmatpush3.bf16.msra.mxu0 %v3686_v52  ;;  %3319 = vmatpush3.bf16.msra.mxu1 %v3687_v25 }
 0xe1e   : > { %3298 = vmatprep.subr.bf16.mxu0 %v3688_v26  ;;  %3320 = vmatprep.subr.bf16.mxu1 %v3689_v27  ;;  %v2809_v27 = vld [vmem:[#allocation3] sm:$0xff] (!%p3213_p3) }
 0xe21   : > { %3299 = vmatpush3.bf16.msra.mxu0 %v3690_v28  ;;  %3321 = vmatpush3.bf16.msra.mxu1 %v3691_v29  ;;  %v3214_v29 = vld [vmem:[%s935_s26] ss:$0 sm:$0xff] (!%p3213_p3) }
 0xe22   : > { %3300 = vmatprep.subr.bf16.mxu0 %v3692_v30  ;;  %3322 = vmatprep.subr.bf16.mxu1 %v3693_v31  ;;  %v2810_v31 = vld [vmem:[#allocation3 + $0x8] sm:$0xff] (!%p3213_p3) }
 0xe25   : > { %3301 = vmatpush3.bf16.msra.mxu0 %v3694_v32  ;;  %3323 = vmatpush3.bf16.msra.mxu1 %v3695_v34 }
 0xedb   : > { %v2397_v44 = vpop.f32.mrb[0].mxu0  ;;  %v2440_v45 = vpop.f32.mrb[0].mxu1 }
 0xedc   : > { %v2398_v47 = vadd.f32 %v2397_v44, %v2302_v40  ;;  %v2441_v55 = vadd.f32 %v2440_v45, %v2310_v41  ;;  %v2399_v46 = vpop.f32.mrb[1].mxu0  ;;  %v2442_v53 = vpop.f32.mrb[1].mxu1 }
 0xedd   : > { %v2400_v48 = vadd.f32 %v2399_v46, %v2306_v42  ;;  %v2443_v49 = vadd.f32 %v2442_v53, %v2314_v43  ;;  %v2401_v54 = vpop.f32.mrb[2].mxu0  ;;  %v2444_v56 = vpop.f32.mrb[2].mxu1 }
 0xede   : > { %v2402_v57 = vadd.f32 %v2401_v54, %v2302_v40  ;;  %v2445_v35 = vadd.f32 %v2444_v56, %v2310_v41  ;;  %v2403_v58 = vpop.f32.mrb[3].mxu0  ;;  %v2446_v59 = vpop.f32.mrb[3].mxu1  ;;  %v2449_v62 = vmax.f32 %v2398_v47, 0.0  ;;  %v2451_v63 = vmax.f32 %v2441_v55, 0.0 }
 0xedf   : > { %v2404_v60 = vadd.f32 %v2403_v58, %v2306_v42  ;;  %v2447_v61 = vadd.f32 %v2446_v59, %v2314_v43  ;;  %v2450_v2 = vmax.f32 %v2400_v48, 0.0  ;;  %v2452_v3 = vmax.f32 %v2443_v49, 0.0  ;;  %v3216_v58 = vld [vmem:[%s941_s12] ss:$0 sm:$0xff] (!%p3213_p3) }
 0xee0   : > { %v2453_v0 = vmax.f32 %v2402_v57, 0.0  ;;  %v2455_v1 = vmax.f32 %v2445_v35, 0.0  ;;  %v3215_v57 = vld [vmem:[%s938_s28] ss:$0 sm:$0xff] (!%p3213_p3) }
 0xee1   : > { %v2454_v4 = vmax.f32 %v2404_v60, 0.0  ;;  %v2456_v6 = vmax.f32 %v2447_v61, 0.0 }
 0xee2   : > { %v2459_v7 = vpack.c.bf16 %v2453_v0, %v2449_v62  ;;  %v2461_v8 = vpack.c.bf16 %v2455_v1, %v2451_v63 }
 0xee3   : > { %v2460_v5 = vpack.c.bf16 %v2454_v4, %v2450_v2  ;;  %v2462_v9 = vpack.c.bf16 %v2456_v6, %v2452_v3 }
 0xee5   : > { %2751 = vmatprep.mubr.bf16.mxu0 %v2460_v5  ;;  %2792 = vmatprep.mubr.bf16.mxu1 %v2462_v9 }
 0xee6   : > { %2752 = vmatmul.mubr.bf16.vlgmr.msra.gmra.mrb[4].mxu0 %v2459_v7  ;;  %2793 = vmatmul.mubr.bf16.vlgmr.msra.gmra.mrb[4].mxu1 %v2461_v8 }
 0xfb9   : > { %v3302_v10 = vpop.f32.mrb[4].mxu0  ;;  %v3324_v11 = vpop.f32.mrb[4].mxu1 }
 0xfba   : > { %v3303_v12 = vpop.f32.mrb[5].mxu0  ;;  %v3325_v13 = vpop.f32.mrb[5].mxu1 }
 0xfbb   : > { %v3304_v14 = vadd.f32 %v3303_v12, %v3302_v10  ;;  %v3326_v15 = vadd.f32 %v3325_v13, %v3324_v11  ;;  %v3305_v16 = vpop.f32.mrb[6].mxu0  ;;  %v3327_v17 = vpop.f32.mrb[6].mxu1 }
 0xfbc   : > { %v3306_v19 = vpop.f32.mrb[7].mxu0  ;;  %v3328_v20 = vpop.f32.mrb[7].mxu1 }
 0xfbd   : > { %v2795_v21 = vadd.f32 %v3326_v15, %v3304_v14  ;;  %v3307_v22 = vadd.f32 %v3306_v19, %v3305_v16  ;;  %v3329_v50 = vadd.f32 %v3328_v20, %v3327_v17  ;;  %2808 = sbr.rel (%p3213_p3) target bundleno = 4363 (0x110b), region = 135 }
 0xfbf   : > { %v2801_v52 = vadd.f32 %v2795_v21, %v2457_v18  ;;  %v2798_v25 = vadd.f32 %v3329_v50, %v3307_v22 }
 0xfc1   : > { %2803 = vst.msk [vmem:[#allocation4] sm:$0xff] %vm2359_vm9, %v2801_v52  ;;  %v2802_v26 = vadd.f32 %v2798_v25, %v2458_v23 }
 0xfc3   : > { %2804 = vst.msk [vmem:[#allocation4 + $0x8] sm:$0xff] %vm2359_vm9, %v2802_v26 }
 0xfc8   : > { %v2811_v28 = vld [vmem:[#allocation4] sm:$0xff] }
 0xfc9   : > { %v2813_v30 = vadd.f32 %v2811_v28, %v2809_v27 }
 0xfca   : > { %v2812_v32 = vld [vmem:[#allocation4 + $0x8] sm:$0xff] }
 0xfcb   : > { %v2814_v34 = vadd.f32 %v2812_v32, %v2810_v31  ;;  %v2822_v36 = vadd.f32 %v3214_v29, %v2813_v30 }
 0xfcd   : > { %v2823_v37 = vadd.f32 %v3214_v29, %v2814_v34  ;;  %v2826_v33 = vsel %vm2359_vm9, %v2822_v36, 0.0 }
 0xfce   : > { %2827 = vadd.xlane.f32.xlu0 %v2826_v33 }
 0xfcf   : > { %v2829_v24 = vsel %vm2359_vm9, %v2823_v37, 0.0 }
 0xfd2   : > { %2830 = vadd.xlane.f32.xlu0 %v2829_v24 }
0x105b   : > { %v2828_v51 = vpop.xlane.xlu0 %2827 }
0x105c   : > { %v2833_v38 = vmul.f32 0.03125, %v2828_v51 }
0x105e   : > { %v2835_v39 = vsub.f32 %v2822_v36, %v2833_v38 }
0x105f   : > { %v2831_v40 = vpop.xlane.xlu0 %2830 }
0x1060   : > { %v2834_v41 = vmul.f32 0.03125, %v2831_v40  ;;  %v2837_v42 = vmul.f32 %v2835_v39, %v2835_v39 }
0x1062   : > { %v2836_v43 = vsub.f32 %v2823_v37, %v2834_v41  ;;  %v2839_v44 = vsel %vm2359_vm9, %v2837_v42, 0.0 }
0x1063   : > { %2840 = vadd.xlane.f32.xlu1 %v2839_v44 }
0x1064   : > { %v2838_v45 = vmul.f32 %v2836_v43, %v2836_v43 }
0x1066   : > { %v2842_v47 = vsel %vm2359_vm9, %v2838_v45, 0.0 }
0x1067   : > { %2843 = vadd.xlane.f32.xlu1 %v2842_v47 }
0x10f0   : > { %v2841_v55 = vpop.xlane.xlu1 %2840 }
0x10f1   : > { %v2845_v46 = vmul.f32 0.03125, %v2841_v55 }
0x10f3   : > { %v2847_v53 = vadd.f32 1e-05, %v2845_v46 }
0x10f4   : > { %v2844_v48 = vpop.xlane.xlu1 %2843 }
0x10f5   : > { %3696 = vrsqrt.f32 %v2847_v53  ;;  %v2846_v49 = vmul.f32 0.03125, %v2844_v48 }
0x10f7   : > { %v2848_v54 = vadd.f32 1e-05, %v2846_v49 }
0x10f9   : > { %3698 = vrsqrt.f32 %v2848_v54 }
0x10ff   : > { %v3697_v56 = vpop.eup %3696 }
0x1100   : > { %v2851_v35 = vmul.f32 %v3697_v56, %v2835_v39 }
0x1102   : > { %v2859_v59 = vmul.f32 %v3215_v57, %v2851_v35 }
0x1103   : > { %v3699_v60 = vpop.eup %3698 }
0x1104   : > { %v2867_v61 = vadd.f32 %v3216_v58, %v2859_v59  ;;  %v2852_v62 = vmul.f32 %v3699_v60, %v2836_v43  ;;  %2874 = sbr.rel (%p3217_p4) target bundleno = 4363 (0x110b), region = 139 }
0x1106   : > { %2869 = vst.msk [vmem:[#allocation2] sm:$0xff] %vm2359_vm9, %v2867_v61  ;;  %v2860_v63 = vmul.f32 %v3215_v57, %v2852_v62  ;;  %2875 = vst.msk [vmem:[#allocation7] sm:$0xff] (!%p3217_p4), %vm2359_vm9, %v2867_v61 }
0x1108   : > { %v2868_v0 = vadd.f32 %v3216_v58, %v2860_v63 }
0x110a   : > { %2870 = vst.msk [vmem:[#allocation2 + $0x8] sm:$0xff] %vm2359_vm9, %v2868_v0  ;;  %2876 = vst.msk [vmem:[#allocation7 + $0x8] sm:$0xff] (!%p3217_p4), %vm2359_vm9, %v2868_v0 }
0x110b PF: > { %s4480_s12 = sld [smem:[#allocation13_spill]]  ;;  %s3794_s16 = smov [#allocation7]  }
0x110c   : > { %s2883_s1 = sshll.u32 %s3794_s16, 4  ;;  %s2884_s1 = int_to_ptr.vmem [resolvable:$true] %s2883_s1 }
0x110d   : > { %s3700_s3 = scalar_lea.vmem %s2884_s1, 256  ;;  %p3707_p9 = scmp.lt.s32.totalorder %s2884_s1, %s2884_s1 }
0x110e   : > { %p3701_p6 = scmp.ne.s32.totalorder %s2884_s1, %s3700_s3  ;;  %p3708_p10 = scmp.lt.s32.totalorder %s3700_s3, %s3700_s3 }
0x1110   : > { %p3709_p11 = por %p3708_p10, %p3707_p9 }
0x1111   : > { %s4481_s19 = sadd.s32 4294967295, %s4480_s12  }
0x1112   : > { %p4338_p5 = scmp.eq.s32.totalorder %s4481_s19, 11 }
0x1114   : > { %p3702_p7 = pnand %p3701_p6, %p4338_p5 }
0x1116   : > { %p3703_p8 = pneg %p3702_p7 }
0x1118   : > { %p3710_p12 = pnand %p3709_p11, %p3703_p8 }
0x111a   : > { %3713 = shalt.err (!%p3710_p12)
}
0x111b   : > { %s4483_s14 = sld [smem:[#allocation35_spill]] }
0x1121   : > { %s3714_s4 = scalar_lea.hbm %s4483_s14, 256 }
0x1122   : > { %p3715_p13 = scmp.ne.s32.totalorder %s4483_s14, %s3714_s4  ;;  %p3720_p2 = scmp.lt.u32.totalorder %s3714_s4, %s4483_s14 }
0x1124   : > { %p3716_p0 = pnand %p3715_p13, %p4338_p5 }
0x1126   : > { %p3717_p1 = pneg %p3716_p0 }
0x1128   : > { %p3722_p3 = pnand %p3720_p2, %p3717_p1 }
0x112a   : > { %3725 = shalt.err (!%p3722_p3)
}
0x112b   : > { %s3795_s13 = smov 128   ;;  %s3796_s15 = smov 8  }
0x112c   : > { %3514 = dma.vmem_to_hbm [thread:$0]  (%p4338_p5), %s2884_s1, 256, %s4483_s14, [#allocation8], %s3795_s13, %s3795_s13, %s3796_s15  }
0x112d   : > { %3755 = dma.done.wait (%p4338_p5), [#allocation8], 256  }
0x112e   : > { %3757 = vsyncadd (%p4338_p5), [#allocation8], 4294967040 }
0x112f PF: > { %s4484_s23 = sld [smem:[#allocation13_spill]]  ;;  %s4485_s1 = sld [smem:[#allocation10_spill]] }
0x1130   : > { %s4486_s22 = sld [smem:[#allocation16_spill]]  ;;  %s4488_s24 = sld [smem:[#allocation12_spill]] }
0x1131   : > { %s4489_s2 = sld [smem:[#allocation14_spill]]  ;;  %s4490_s25 = sld [smem:[#allocation15_spill]] }
0x1135   : > { %s31_s3 = sadd.s32 1, %s4484_s23   ;;  %s4487_s23 = sld [smem:[#allocation11_spill]] }
0x1136   : > { %p28_p4 = scmp.ge.s32.totalorder %s31_s3, 14  }
0x1138   :  { %30 = sbr.rel (!%p28_p4) target bundleno = 23 (0x17), region = 216 }
0x113f   :  { %2899 = vsyncpa [#allocation8], 1 }
0x1140   :  { %2901 = vsyncpa [#allocation8 + $0x1], 1 }

</bundles_post_ra>
